<compile_context>
chip_gen: v6e
topology: v6e:2x2x1
jax: 0.10.0
libtpu: 0.0.40
codegen_flags: <defaults>
</compile_context>

<pallas_src>
import jax
import jax.numpy as jnp
import numpy as np
from jax import lax
from jax.experimental import pallas as pl
from jax.experimental.pallas import tpu as pltpu

_GELU_C = 0.7978845608028654  # sqrt(2 / pi)
_MAX_UNROLLED_TAPS = 32       # full Python unroll below this, fori_loop above


def _longconv_kernel(u_ref, hist_ref, k_ref, d2_ref, wa_ref, wb_ref, ba_ref,
                     bb_ref, o_ref, buf_ref):
    """One (batch, L-tile) step: causal depthwise conv + GELU + (H->2H) GLU."""
    l = pl.program_id(1)
    K = k_ref.shape[0]                 # number of conv taps (static)
    TL = o_ref.shape[1]                # rows in this L-tile (static)
    K_pad = buf_ref.shape[0] - TL      # history rows, multiple of 8 (static)
    H = buf_ref.shape[1]

    u = u_ref[0]                       # (TL, H), input dtype

    # Stage [causal history ; current tile] contiguously, in the INPUT dtype,
    # so every conv tap is a single (TL, H) slice at a compile-time offset.
    @pl.when(l == 0)
    def _():                           # first L-tile of the sequence: zero history
        buf_ref[:K_pad, :] = jnp.zeros((K_pad, H), buf_ref.dtype)

    @pl.when(l > 0)
    def _():                           # otherwise: the K_pad rows just before it
        buf_ref[:K_pad, :] = hist_ref[0]

    buf_ref[K_pad:, :] = u

    u32 = u.astype(jnp.float32)

    # Tap 0 (no shift) folded into the D skip.  The reference adds the D skip
    # twice; the factor 2 is pre-folded into d2 on the wrapper side.
    y = u32 * (d2_ref[...] + k_ref[pl.ds(0, 1), :])

    # Remaining taps of the causal depthwise long conv:
    #   y[i, h] += k[j, h] * u[i - j, h]
    def tap(j, acc):
        seg = buf_ref[pl.ds(K_pad - j, TL), :].astype(jnp.float32)
        return acc + seg * k_ref[pl.ds(j, 1), :]

    if K <= _MAX_UNROLLED_TAPS:
        for j in range(1, K):          # static offsets -> statically scheduled vlds
            y = tap(j, y)
    else:
        y = lax.fori_loop(1, K, tap, y, unroll=16)

    # tanh-GELU (EUP tanh; deviates <~1e-3 abs from torch's exact erf GELU).
    y = 0.5 * y * (1.0 + jnp.tanh(_GELU_C * (y + 0.044715 * (y * y * y))))

    # output_linear (H -> 2H) as two lane-dense (H, H) bf16 MXU matmuls with
    # fp32 accumulation, issued back to back before any epilogue work.
    # TODO(synk): when H % 128 == 0 a single (H, 2H) matmul + free lane slice
    # gives one longer MXU stream (review item); split kept for generic H.
    y_bf = y.astype(jnp.bfloat16)
    z_a = jnp.dot(y_bf, wa_ref[...], preferred_element_type=jnp.float32) + ba_ref[...]
    z_b = jnp.dot(y_bf, wb_ref[...], preferred_element_type=jnp.float32) + bb_ref[...]

    # GLU gate: sigmoid(z) == 0.5 * (1 + tanh(z / 2)) -> a single EUP op.
    gate = 0.5 + 0.5 * jnp.tanh(0.5 * z_b)
    o_ref[0] = (z_a * gate).astype(o_ref.dtype)


def _vmem_capacity_bytes(default=64 << 20):
    try:
        return int(pltpu.get_tpu_info().vmem_capacity_bytes)
    except Exception:
        return default                 # conservative (v7x-sized) fallback


def _vmem_bytes_estimate(tl, K, K_pad, H, in_dsize, const_bufs=2):
    """Rough per-kernel VMEM footprint for the tiling / limit heuristics."""
    io = 2 * (tl + K_pad + tl) * H * in_dsize            # double-buffered u / hist / out
    scratch = (K_pad + tl) * H * in_dsize                # [history ; tile] staging
    consts = const_bufs * ((K + 1) * H * 4 + 2 * H * H * 2 + 2 * H * 4)
    return io + scratch + consts


def _choose_tl(L, K, K_pad, H, in_dsize, target_rows=512):
    """Largest multiple of K_pad dividing L that is <= ~512 rows and fits VMEM."""
    budget = _vmem_capacity_bytes() - (8 << 20)          # headroom for compiler scratch
    best = K_pad                                         # always valid (L % K_pad == 0)
    t = K_pad
    limit = min(L, max(target_rows, K_pad))
    while t <= limit:
        if L % t == 0 and _vmem_bytes_estimate(t, K, K_pad, H, in_dsize) <= budget:
            best = t
        t += K_pad
    return best


def _const_spec(shape, single_buffer):
    """BlockSpec for a block that never changes across the grid."""
    index_map = lambda b, l: (0,) * len(shape)
    if single_buffer:
        try:
            # Constant-index blocks are fetched once; a single VMEM buffer
            # halves their footprint (review: v7x / v5e VMEM budget).
            return pl.BlockSpec(shape, index_map, pipeline_mode=pl.Buffered(1))
        except (AttributeError, TypeError):
            pass                                          # older JAX: double-buffered
    return pl.BlockSpec(shape, index_map)


def flash_longconv_forward(u, k_squashed, D, W_lin, b_lin, *, tl=None,
                           vmem_limit_bytes=None):
    """u: (B, L, H); k_squashed: (1, H, K); D: (1, H); W_lin: (2H, H); b_lin: (2H,)."""
    B, L, H = u.shape
    K = int(min(k_squashed.shape[-1], L))   # causal: taps >= L can never contribute
    K_pad = ((K + 7) // 8) * 8              # history rows, padded to a sublane multiple
    in_dsize = jnp.dtype(u.dtype).itemsize

    assert L % K_pad == 0, ("sequence length must be a multiple of the "
                            "(8-padded) conv kernel length; pad L or the kernel")
    # TODO(synk): relax the divisibility constraints (cdiv grid + masked last
    # tile) so TL can stay near the VMEM budget for awkward L.
    # TODO(synk): for production H < 128, fold heads/batch onto the lane axis
    # (lane-dense output was the biggest measured lever); H that is a multiple
    # of 128 needs no change.
    if tl is None:
        tl = _choose_tl(L, K, K_pad, H, in_dsize)
    assert L % tl == 0, "L-tile must divide L"
    assert tl >= K_pad and tl % K_pad == 0, \
        "L-tile must be a multiple of the padded conv kernel length"
    ratio = tl // K_pad

    # Parameters staged once per launch.
    k_t = jnp.transpose(k_squashed[0, :, :K].astype(jnp.float32))   # (K, H)
    d2 = (2.0 * D).astype(jnp.float32)                              # (1, H): D skip x2 pre-folded
    w_a = jnp.transpose(W_lin[:H, :]).astype(jnp.bfloat16)          # (H, H)
    w_b = jnp.transpose(W_lin[H:, :]).astype(jnp.bfloat16)          # (H, H)
    b_a = b_lin[:H].astype(jnp.float32).reshape(1, H)
    b_b = b_lin[H:].astype(jnp.float32).reshape(1, H)

    if vmem_limit_bytes is None:
        est = _vmem_bytes_estimate(tl, K, K_pad, H, in_dsize)
        if est > (12 << 20):            # beyond the smallest default scoped limit
            cap = _vmem_capacity_bytes()
            vmem_limit_bytes = int(min(cap - (2 << 20), max(2 * est, 32 << 20)))

    def build(single_buffer_consts):
        cp = dict(dimension_semantics=("parallel", "parallel"))
        if vmem_limit_bytes is not None:
            cp["vmem_limit_bytes"] = int(vmem_limit_bytes)
        return pl.pallas_call(
            _longconv_kernel,
            out_shape=jax.ShapeDtypeStruct((B, L, H), u.dtype),
            grid_spec=pltpu.PrefetchScalarGridSpec(
                num_scalar_prefetch=0,
                grid=(B, L // tl),
                in_specs=[
                    # current (TL, H) tile of u
                    pl.BlockSpec((1, tl, H), lambda b, l: (b, l, 0)),
                    # the K_pad rows of u just before the tile (causal history);
                    # clamped to block 0 at l == 0 and zeroed inside the kernel.
                    pl.BlockSpec((1, K_pad, H),
                                 lambda b, l: (b, jnp.maximum(l * ratio - 1, 0), 0)),
                    _const_spec((K, H), single_buffer_consts),   # conv taps (fp32)
                    _const_spec((1, H), single_buffer_consts),   # 2*D skip
                    _const_spec((H, H), single_buffer_consts),   # W_a (bf16)
                    _const_spec((H, H), single_buffer_consts),   # W_b (bf16)
                    _const_spec((1, H), single_buffer_consts),   # b_a
                    _const_spec((1, H), single_buffer_consts),   # b_b
                ],
                out_specs=pl.BlockSpec((1, tl, H), lambda b, l: (b, l, 0)),
                scratch_shapes=[
                    # [history ; tile] staging buffer, kept in the input dtype.
                    pltpu.VMEM((K_pad + tl, H), u.dtype),
                ],
            ),
            compiler_params=pltpu.CompilerParams(**cp),
        )

    args = (u, u, k_t, d2, w_a, w_b, b_a, b_b)
    try:
        return build(True)(*args)
    except Exception:
        # Graceful fallback for JAX versions where single-buffered constant
        # blocks (pipeline_mode=pl.Buffered(1)) are not supported.
        return build(False)(*args)


def reference_forward(u, k_squashed, D, W_lin, b_lin):
    """Pure-JAX mirror of the PyTorch forward (FFT conv, fp32) for validation."""
    B, L, H = u.shape
    K = k_squashed.shape[-1]
    o_dtype = u.dtype
    ut = jnp.transpose(u, (0, 2, 1)).astype(jnp.float32)       # (B, H, L)
    n = K + L                                                  # L_kernel + L
    k_f = jnp.fft.rfft(k_squashed.astype(jnp.float32), n=n)    # (1, H, nf)
    u_f = jnp.fft.rfft(ut, n=n)                                # (B, H, nf)
    y_f = jnp.einsum('bhl,chl->bchl', u_f, k_f)
    y = jnp.fft.irfft(y_f, n=n)[..., :L]                       # (B, 1, H, L)
    d32 = D.astype(jnp.float32)
    y = y + jnp.einsum('bhl,ch->bchl', ut, d32)
    y = y + jnp.einsum('bhl,ch->bchl', ut, d32)                # D skip added twice
    y = y.reshape(B, H, L)
    y = jnp.transpose(y, (0, 2, 1))                            # (B, L, H)
    y = jax.nn.gelu(y, approximate=False)
    z = y @ W_lin.T.astype(jnp.float32) + b_lin.astype(jnp.float32)
    y = z[..., :H] * jax.nn.sigmoid(z[..., H:])                # GLU
    return y.astype(o_dtype)


if __name__ == "__main__":
    # config.hidden_size = 32, conv1d_config['long_conv_kernel'] = 8, channels = 1
    B, L, H, K = 2, 16, 32, 8
    key = jax.random.PRNGKey(0)
    k_u, k_D, k_k, k_W, k_b = jax.random.split(key, 5)

    u = jax.random.normal(k_u, (B, L, H), jnp.float32)

    # Deterministic parameter init (shapes from FlashLongconvLayer.__init__):
    D = jax.random.normal(k_D, (1, H), jnp.float32)                      # self.D (channels, H)
    kernel_raw = 0.05 * jax.random.normal(k_k, (1, H, K), jnp.float32)   # LongConvKernel.kernel
    lam = 0.003
    # LongConvKernel.forward "squash": relu(|k| - lam) * sign(k); dropout=0 -> identity
    k_squashed = jnp.maximum(jnp.abs(kernel_raw) - lam, 0.0) * jnp.sign(kernel_raw)
    # output_linear: nn.Linear(H, 2H) (GLU doubles d_output), default-style uniform init
    bound = 1.0 / np.sqrt(H)
    W_lin = jax.random.uniform(k_W, (2 * H, H), jnp.float32, -bound, bound)
    b_lin = jax.random.uniform(k_b, (2 * H,), jnp.float32, -bound, bound)

    ref = reference_forward(u, k_squashed, D, W_lin, b_lin)

    # tl=8 -> two L-tiles per batch: exercises the HBM-fetched causal history.
    out = flash_longconv_forward(u, k_squashed, D, W_lin, b_lin, tl=8)
    out = jax.block_until_ready(out)
    assert out.shape == (B, L, H) and out.dtype == u.dtype
    # Tolerance reflects the documented contract: bf16-MXU output linear
    # (fp32 accumulation) + tanh-GELU + tanh-form sigmoid gate.
    np.testing.assert_allclose(np.asarray(out), np.asarray(ref), rtol=2e-2, atol=2e-2)

    # Auto-chosen L-tile (single tile per batch at this size): l == 0 path.
    out2 = jax.block_until_ready(
        flash_longconv_forward(u, k_squashed, D, W_lin, b_lin))
    np.testing.assert_allclose(np.asarray(out2), np.asarray(ref), rtol=2e-2, atol=2e-2)

    print("KERNEL_OK")
</pallas_src>

<mosaic_0001>
module attributes {stable_mosaic.version = 11 : i64} {
  func.func @_longconv_kernel(%arg0: i32, %arg1: i32, %arg2: memref<1x8x32xf32, #tpu.memory_space<vmem>>, %arg3: memref<1x8x32xf32, #tpu.memory_space<vmem>>, %arg4: memref<8x32xf32, #tpu.memory_space<vmem>>, %arg5: memref<1x32xf32, #tpu.memory_space<vmem>>, %arg6: memref<32x32xbf16, #tpu.memory_space<vmem>>, %arg7: memref<32x32xbf16, #tpu.memory_space<vmem>>, %arg8: memref<1x32xf32, #tpu.memory_space<vmem>>, %arg9: memref<1x32xf32, #tpu.memory_space<vmem>>, %arg10: memref<1x8x32xf32, #tpu.memory_space<vmem>>, %arg11: memref<16x32xf32, #tpu.memory_space<vmem>>) attributes {dimension_semantics = [#tpu.dimension_semantics<parallel>, #tpu.dimension_semantics<parallel>], iteration_bounds = array<i64: 2, 2>, scalar_prefetch = 0 : i64, scratch_operands = 1 : i64, tpu.core_type = #tpu.core_type<tc>, window_params = [{transform_indices = @transform_0, window_bounds = array<i64: 1, 8, 32>}, {transform_indices = @transform_1, window_bounds = array<i64: 1, 8, 32>}, {pipeline_mode = #tpu.pipeline_mode<synchronous>, transform_indices = @transform_2, window_bounds = array<i64: 8, 32>}, {pipeline_mode = #tpu.pipeline_mode<synchronous>, transform_indices = @transform_3, window_bounds = array<i64: 1, 32>}, {pipeline_mode = #tpu.pipeline_mode<synchronous>, transform_indices = @transform_4, window_bounds = array<i64: 32, 32>}, {pipeline_mode = #tpu.pipeline_mode<synchronous>, transform_indices = @transform_5, window_bounds = array<i64: 32, 32>}, {pipeline_mode = #tpu.pipeline_mode<synchronous>, transform_indices = @transform_6, window_bounds = array<i64: 1, 32>}, {pipeline_mode = #tpu.pipeline_mode<synchronous>, transform_indices = @transform_7, window_bounds = array<i64: 1, 32>}, {transform_indices = @transform_8, window_bounds = array<i64: 1, 8, 32>}]} {
    %c0 = arith.constant 0 : index
    %c0_0 = arith.constant 0 : index
    %c0_1 = arith.constant 0 : index
    %0 = vector.load %arg2[%c0, %c0_0, %c0_1] : memref<1x8x32xf32, #tpu.memory_space<vmem>>, vector<1x8x32xf32>
    %1 = vector.shape_cast %0 : vector<1x8x32xf32> to vector<8x32xf32>
    %c0_i32 = arith.constant 0 : i32
    %2 = arith.cmpi eq, %arg1, %c0_i32 : i32
    %3 = arith.extui %2 : i1 to i32
    %c0_i32_2 = arith.constant 0 : i32
    %4 = arith.cmpi ne, %3, %c0_i32_2 : i32
    scf.if %4 {
      %cst_50 = arith.constant 0.000000e+00 : f32
      %84 = vector.broadcast %cst_50 : f32 to vector<8x32xf32>
      %c0_51 = arith.constant 0 : index
      %c0_52 = arith.constant 0 : index
      %85 = vector.load %arg11[%c0_51, %c0_52] : memref<16x32xf32, #tpu.memory_space<vmem>>, vector<8x32xf32>
      tpu.vector_store %arg11[%c0_51, %c0_52], %84 {strides = array<i32>} : memref<16x32xf32, #tpu.memory_space<vmem>>, vector<8x32xf32>,
    } else {
    }
    %c0_i32_3 = arith.constant 0 : i32
    %5 = arith.cmpi sgt, %arg1, %c0_i32_3 : i32
    %6 = arith.extui %5 : i1 to i32
    %c0_i32_4 = arith.constant 0 : i32
    %7 = arith.cmpi ne, %6, %c0_i32_4 : i32
    scf.if %7 {
      %c0_50 = arith.constant 0 : index
      %c0_51 = arith.constant 0 : index
      %c0_52 = arith.constant 0 : index
      %84 = vector.load %arg3[%c0_50, %c0_51, %c0_52] : memref<1x8x32xf32, #tpu.memory_space<vmem>>, vector<1x8x32xf32>
      %85 = vector.shape_cast %84 : vector<1x8x32xf32> to vector<8x32xf32>
      %c0_53 = arith.constant 0 : index
      %c0_54 = arith.constant 0 : index
      %86 = vector.load %arg11[%c0_53, %c0_54] : memref<16x32xf32, #tpu.memory_space<vmem>>, vector<8x32xf32>
      tpu.vector_store %arg11[%c0_53, %c0_54], %85 {strides = array<i32>} : memref<16x32xf32, #tpu.memory_space<vmem>>, vector<8x32xf32>,
    } else {
    }
    %c8 = arith.constant 8 : index
    %c0_5 = arith.constant 0 : index
    %8 = vector.load %arg11[%c8, %c0_5] : memref<16x32xf32, #tpu.memory_space<vmem>>, vector<8x32xf32>
    tpu.vector_store %arg11[%c8, %c0_5], %1 {strides = array<i32>} : memref<16x32xf32, #tpu.memory_space<vmem>>, vector<8x32xf32>,
    %c0_6 = arith.constant 0 : index
    %c0_7 = arith.constant 0 : index
    %9 = vector.load %arg5[%c0_6, %c0_7] : memref<1x32xf32, #tpu.memory_space<vmem>>, vector<1x32xf32>
    %c0_8 = arith.constant 0 : index
    %c0_9 = arith.constant 0 : index
    %10 = vector.load %arg4[%c0_8, %c0_9] : memref<8x32xf32, #tpu.memory_space<vmem>>, vector<1x32xf32>
    %11 = arith.addf %9, %10 : vector<1x32xf32>
    %12 = vector.broadcast %11 : vector<1x32xf32> to vector<8x32xf32>
    %13 = arith.mulf %1, %12 : vector<8x32xf32>
    %c7 = arith.constant 7 : index
    %c0_10 = arith.constant 0 : index
    %14 = vector.load %arg11[%c7, %c0_10] : memref<16x32xf32, #tpu.memory_space<vmem>>, vector<8x32xf32>
    %c1 = arith.constant 1 : index
    %c0_11 = arith.constant 0 : index
    %15 = vector.load %arg4[%c1, %c0_11] : memref<8x32xf32, #tpu.memory_space<vmem>>, vector<1x32xf32>
    %16 = vector.broadcast %15 : vector<1x32xf32> to vector<8x32xf32>
    %17 = arith.mulf %14, %16 : vector<8x32xf32>
    %18 = arith.addf %13, %17 : vector<8x32xf32>
    %c6 = arith.constant 6 : index
    %c0_12 = arith.constant 0 : index
    %19 = vector.load %arg11[%c6, %c0_12] : memref<16x32xf32, #tpu.memory_space<vmem>>, vector<8x32xf32>
    %c2 = arith.constant 2 : index
    %c0_13 = arith.constant 0 : index
    %20 = vector.load %arg4[%c2, %c0_13] : memref<8x32xf32, #tpu.memory_space<vmem>>, vector<1x32xf32>
    %21 = vector.broadcast %20 : vector<1x32xf32> to vector<8x32xf32>
    %22 = arith.mulf %19, %21 : vector<8x32xf32>
    %23 = arith.addf %18, %22 : vector<8x32xf32>
    %c5 = arith.constant 5 : index
    %c0_14 = arith.constant 0 : index
    %24 = vector.load %arg11[%c5, %c0_14] : memref<16x32xf32, #tpu.memory_space<vmem>>, vector<8x32xf32>
    %c3 = arith.constant 3 : index
    %c0_15 = arith.constant 0 : index
    %25 = vector.load %arg4[%c3, %c0_15] : memref<8x32xf32, #tpu.memory_space<vmem>>, vector<1x32xf32>
    %26 = vector.broadcast %25 : vector<1x32xf32> to vector<8x32xf32>
    %27 = arith.mulf %24, %26 : vector<8x32xf32>
    %28 = arith.addf %23, %27 : vector<8x32xf32>
    %c4 = arith.constant 4 : index
    %c0_16 = arith.constant 0 : index
    %29 = vector.load %arg11[%c4, %c0_16] : memref<16x32xf32, #tpu.memory_space<vmem>>, vector<8x32xf32>
    %c4_17 = arith.constant 4 : index
    %c0_18 = arith.constant 0 : index
    %30 = vector.load %arg4[%c4_17, %c0_18] : memref<8x32xf32, #tpu.memory_space<vmem>>, vector<1x32xf32>
    %31 = vector.broadcast %30 : vector<1x32xf32> to vector<8x32xf32>
    %32 = arith.mulf %29, %31 : vector<8x32xf32>
    %33 = arith.addf %28, %32 : vector<8x32xf32>
    %c3_19 = arith.constant 3 : index
    %c0_20 = arith.constant 0 : index
    %34 = vector.load %arg11[%c3_19, %c0_20] : memref<16x32xf32, #tpu.memory_space<vmem>>, vector<8x32xf32>
    %c5_21 = arith.constant 5 : index
    %c0_22 = arith.constant 0 : index
    %35 = vector.load %arg4[%c5_21, %c0_22] : memref<8x32xf32, #tpu.memory_space<vmem>>, vector<1x32xf32>
    %36 = vector.broadcast %35 : vector<1x32xf32> to vector<8x32xf32>
    %37 = arith.mulf %34, %36 : vector<8x32xf32>
    %38 = arith.addf %33, %37 : vector<8x32xf32>
    %c2_23 = arith.constant 2 : index
    %c0_24 = arith.constant 0 : index
    %39 = vector.load %arg11[%c2_23, %c0_24] : memref<16x32xf32, #tpu.memory_space<vmem>>, vector<8x32xf32>
    %c6_25 = arith.constant 6 : index
    %c0_26 = arith.constant 0 : index
    %40 = vector.load %arg4[%c6_25, %c0_26] : memref<8x32xf32, #tpu.memory_space<vmem>>, vector<1x32xf32>
    %41 = vector.broadcast %40 : vector<1x32xf32> to vector<8x32xf32>
    %42 = arith.mulf %39, %41 : vector<8x32xf32>
    %43 = arith.addf %38, %42 : vector<8x32xf32>
    %c1_27 = arith.constant 1 : index
    %c0_28 = arith.constant 0 : index
    %44 = vector.load %arg11[%c1_27, %c0_28] : memref<16x32xf32, #tpu.memory_space<vmem>>, vector<8x32xf32>
    %c7_29 = arith.constant 7 : index
    %c0_30 = arith.constant 0 : index
    %45 = vector.load %arg4[%c7_29, %c0_30] : memref<8x32xf32, #tpu.memory_space<vmem>>, vector<1x32xf32>
    %46 = vector.broadcast %45 : vector<1x32xf32> to vector<8x32xf32>
    %47 = arith.mulf %44, %46 : vector<8x32xf32>
    %48 = arith.addf %43, %47 : vector<8x32xf32>
    %cst = arith.constant 5.000000e-01 : f32
    %49 = vector.broadcast %cst : f32 to vector<8x32xf32>
    %50 = arith.mulf %49, %48 : vector<8x32xf32>
    %51 = arith.mulf %48, %48 : vector<8x32xf32>
    %52 = arith.mulf %51, %48 : vector<8x32xf32>
    %cst_31 = arith.constant 4.471500e-02 : f32
    %53 = vector.broadcast %cst_31 : f32 to vector<8x32xf32>
    %54 = arith.mulf %53, %52 : vector<8x32xf32>
    %55 = arith.addf %48, %54 : vector<8x32xf32>
    %cst_32 = arith.constant 0.797884583 : f32
    %56 = vector.broadcast %cst_32 : f32 to vector<8x32xf32>
    %57 = arith.mulf %56, %55 : vector<8x32xf32>
    %58 = math.tanh %57 : vector<8x32xf32>
    %cst_33 = arith.constant 1.000000e+00 : f32
    %59 = vector.broadcast %cst_33 : f32 to vector<8x32xf32>
    %60 = arith.addf %59, %58 : vector<8x32xf32>
    %61 = arith.mulf %50, %60 : vector<8x32xf32>
    %62 = arith.truncf %61 : vector<8x32xf32> to vector<8x32xbf16>
    %c0_34 = arith.constant 0 : index
    %c0_35 = arith.constant 0 : index
    %63 = vector.load %arg6[%c0_34, %c0_35] : memref<32x32xbf16, #tpu.memory_space<vmem>>, vector<32x32xbf16>
    %cst_36 = arith.constant dense<0.000000e+00> : vector<8x32xf32>
    %64 = tpu.matmul %62, %63, %cst_36 {dimension_numbers = #tpu.dot_dimension_numbers<[1], [0], [0], [1], [0, 0, 1, 1], [], []>} : vector<8x32xbf16>, vector<32x32xbf16>, vector<8x32xf32> -> vector<8x32xf32>
    %c0_37 = arith.constant 0 : index
    %c0_38 = arith.constant 0 : index
    %65 = vector.load %arg8[%c0_37, %c0_38] : memref<1x32xf32, #tpu.memory_space<vmem>>, vector<1x32xf32>
    %66 = vector.broadcast %65 : vector<1x32xf32> to vector<8x32xf32>
    %67 = arith.addf %64, %66 : vector<8x32xf32>
    %c0_39 = arith.constant 0 : index
    %c0_40 = arith.constant 0 : index
    %68 = vector.load %arg7[%c0_39, %c0_40] : memref<32x32xbf16, #tpu.memory_space<vmem>>, vector<32x32xbf16>
    %cst_41 = arith.constant dense<0.000000e+00> : vector<8x32xf32>
    %69 = tpu.matmul %62, %68, %cst_41 {dimension_numbers = #tpu.dot_dimension_numbers<[1], [0], [0], [1], [0, 0, 1, 1], [], []>} : vector<8x32xbf16>, vector<32x32xbf16>, vector<8x32xf32> -> vector<8x32xf32>
    %c0_42 = arith.constant 0 : index
    %c0_43 = arith.constant 0 : index
    %70 = vector.load %arg9[%c0_42, %c0_43] : memref<1x32xf32, #tpu.memory_space<vmem>>, vector<1x32xf32>
    %71 = vector.broadcast %70 : vector<1x32xf32> to vector<8x32xf32>
    %72 = arith.addf %69, %71 : vector<8x32xf32>
    %cst_44 = arith.constant 5.000000e-01 : f32
    %73 = vector.broadcast %cst_44 : f32 to vector<8x32xf32>
    %74 = arith.mulf %73, %72 : vector<8x32xf32>
    %75 = math.tanh %74 : vector<8x32xf32>
    %cst_45 = arith.constant 5.000000e-01 : f32
    %76 = vector.broadcast %cst_45 : f32 to vector<8x32xf32>
    %77 = arith.mulf %76, %75 : vector<8x32xf32>
    %cst_46 = arith.constant 5.000000e-01 : f32
    %78 = vector.broadcast %cst_46 : f32 to vector<8x32xf32>
    %79 = arith.addf %78, %77 : vector<8x32xf32>
    %80 = arith.mulf %67, %79 : vector<8x32xf32>
    %c0_47 = arith.constant 0 : index
    %c0_48 = arith.constant 0 : index
    %c0_49 = arith.constant 0 : index
    %81 = vector.load %arg10[%c0_47, %c0_48, %c0_49] : memref<1x8x32xf32, #tpu.memory_space<vmem>>, vector<1x8x32xf32>
    %82 = vector.shape_cast %81 : vector<1x8x32xf32> to vector<8x32xf32>
    %83 = vector.shape_cast %80 : vector<8x32xf32> to vector<1x8x32xf32>
    tpu.vector_store %arg10[%c0_47, %c0_48, %c0_49], %83 {strides = array<i32>} : memref<1x8x32xf32, #tpu.memory_space<vmem>>, vector<1x8x32xf32>,
    return
  }
  func.func @transform_0(%arg0: i32, %arg1: i32) -> (i32, i32, i32) {
    %c0_i32 = arith.constant 0 : i32
    %c0_i32_0 = arith.constant 0 : i32
    return %arg0, %arg1, %c0_i32 : i32, i32, i32
  }
  func.func @transform_1(%arg0: i32, %arg1: i32) -> (i32, i32, i32) {
    %c1_i32 = arith.constant 1 : i32
    %0 = arith.muli %arg1, %c1_i32 : i32
    %c1_i32_0 = arith.constant 1 : i32
    %1 = arith.subi %0, %c1_i32_0 : i32
    %c0_i32 = arith.constant 0 : i32
    %2 = arith.maxsi %1, %c0_i32 : i32
    %c0_i32_1 = arith.constant 0 : i32
    %c0_i32_2 = arith.constant 0 : i32
    return %arg0, %2, %c0_i32_1 : i32, i32, i32
  }
  func.func @transform_2(%arg0: i32, %arg1: i32) -> (i32, i32) {
    %c0_i32 = arith.constant 0 : i32
    %c0_i32_0 = arith.constant 0 : i32
    %c0_i32_1 = arith.constant 0 : i32
    return %c0_i32, %c0_i32_0 : i32, i32
  }
  func.func @transform_3(%arg0: i32, %arg1: i32) -> (i32, i32) {
    %c0_i32 = arith.constant 0 : i32
    %c0_i32_0 = arith.constant 0 : i32
    %c0_i32_1 = arith.constant 0 : i32
    return %c0_i32, %c0_i32_0 : i32, i32
  }
  func.func @transform_4(%arg0: i32, %arg1: i32) -> (i32, i32) {
    %c0_i32 = arith.constant 0 : i32
    %c0_i32_0 = arith.constant 0 : i32
    %c0_i32_1 = arith.constant 0 : i32
    return %c0_i32, %c0_i32_0 : i32, i32
  }
  func.func @transform_5(%arg0: i32, %arg1: i32) -> (i32, i32) {
    %c0_i32 = arith.constant 0 : i32
    %c0_i32_0 = arith.constant 0 : i32
    %c0_i32_1 = arith.constant 0 : i32
    return %c0_i32, %c0_i32_0 : i32, i32
  }
  func.func @transform_6(%arg0: i32, %arg1: i32) -> (i32, i32) {
    %c0_i32 = arith.constant 0 : i32
    %c0_i32_0 = arith.constant 0 : i32
    %c0_i32_1 = arith.constant 0 : i32
    return %c0_i32, %c0_i32_0 : i32, i32
  }
  func.func @transform_7(%arg0: i32, %arg1: i32) -> (i32, i32) {
    %c0_i32 = arith.constant 0 : i32
    %c0_i32_0 = arith.constant 0 : i32
    %c0_i32_1 = arith.constant 0 : i32
    return %c0_i32, %c0_i32_0 : i32, i32
  }
  func.func @transform_8(%arg0: i32, %arg1: i32) -> (i32, i32, i32) {
    %c0_i32 = arith.constant 0 : i32
    %c0_i32_0 = arith.constant 0 : i32
    return %arg0, %arg1, %c0_i32 : i32, i32, i32
  }
}

module attributes {stable_mosaic.version = 11 : i64} {
  func.func @_longconv_kernel(%arg0: i32, %arg1: i32, %arg2: memref<1x8x32xf32, #tpu.memory_space<vmem>>, %arg3: memref<1x8x32xf32, #tpu.memory_space<vmem>>, %arg4: memref<8x32xf32, #tpu.memory_space<vmem>>, %arg5: memref<1x32xf32, #tpu.memory_space<vmem>>, %arg6: memref<32x32xbf16, #tpu.memory_space<vmem>>, %arg7: memref<32x32xbf16, #tpu.memory_space<vmem>>, %arg8: memref<1x32xf32, #tpu.memory_space<vmem>>, %arg9: memref<1x32xf32, #tpu.memory_space<vmem>>, %arg10: memref<1x8x32xf32, #tpu.memory_space<vmem>>, %arg11: memref<16x32xf32, #tpu.memory_space<vmem>>) attributes {dimension_semantics = [#tpu.dimension_semantics<parallel>, #tpu.dimension_semantics<parallel>], iteration_bounds = array<i64: 2, 2>, scalar_prefetch = 0 : i64, scratch_operands = 1 : i64, tpu.core_type = #tpu.core_type<tc>, window_params = [{transform_indices = @transform_0, window_bounds = array<i64: 1, 8, 32>}, {transform_indices = @transform_1, window_bounds = array<i64: 1, 8, 32>}, {pipeline_mode = #tpu.pipeline_mode<synchronous>, transform_indices = @transform_2, window_bounds = array<i64: 8, 32>}, {pipeline_mode = #tpu.pipeline_mode<synchronous>, transform_indices = @transform_3, window_bounds = array<i64: 1, 32>}, {pipeline_mode = #tpu.pipeline_mode<synchronous>, transform_indices = @transform_4, window_bounds = array<i64: 32, 32>}, {pipeline_mode = #tpu.pipeline_mode<synchronous>, transform_indices = @transform_5, window_bounds = array<i64: 32, 32>}, {pipeline_mode = #tpu.pipeline_mode<synchronous>, transform_indices = @transform_6, window_bounds = array<i64: 1, 32>}, {pipeline_mode = #tpu.pipeline_mode<synchronous>, transform_indices = @transform_7, window_bounds = array<i64: 1, 32>}, {transform_indices = @transform_8, window_bounds = array<i64: 1, 8, 32>}]} {
    %c0 = arith.constant 0 : index
    %c0_0 = arith.constant 0 : index
    %c0_1 = arith.constant 0 : index
    %0 = vector.load %arg2[%c0, %c0_0, %c0_1] : memref<1x8x32xf32, #tpu.memory_space<vmem>>, vector<1x8x32xf32>
    %1 = vector.shape_cast %0 : vector<1x8x32xf32> to vector<8x32xf32>
    %c0_i32 = arith.constant 0 : i32
    %2 = arith.cmpi eq, %arg1, %c0_i32 : i32
    %3 = arith.extui %2 : i1 to i32
    %c0_i32_2 = arith.constant 0 : i32
    %4 = arith.cmpi ne, %3, %c0_i32_2 : i32
    scf.if %4 {
      %cst_50 = arith.constant 0.000000e+00 : f32
      %84 = vector.broadcast %cst_50 : f32 to vector<8x32xf32>
      %c0_51 = arith.constant 0 : index
      %c0_52 = arith.constant 0 : index
      %85 = vector.load %arg11[%c0_51, %c0_52] : memref<16x32xf32, #tpu.memory_space<vmem>>, vector<8x32xf32>
      tpu.vector_store %arg11[%c0_51, %c0_52], %84 {strides = array<i32>} : memref<16x32xf32, #tpu.memory_space<vmem>>, vector<8x32xf32>,
    } else {
    }
    %c0_i32_3 = arith.constant 0 : i32
    %5 = arith.cmpi sgt, %arg1, %c0_i32_3 : i32
    %6 = arith.extui %5 : i1 to i32
    %c0_i32_4 = arith.constant 0 : i32
    %7 = arith.cmpi ne, %6, %c0_i32_4 : i32
    scf.if %7 {
      %c0_50 = arith.constant 0 : index
      %c0_51 = arith.constant 0 : index
      %c0_52 = arith.constant 0 : index
      %84 = vector.load %arg3[%c0_50, %c0_51, %c0_52] : memref<1x8x32xf32, #tpu.memory_space<vmem>>, vector<1x8x32xf32>
      %85 = vector.shape_cast %84 : vector<1x8x32xf32> to vector<8x32xf32>
      %c0_53 = arith.constant 0 : index
      %c0_54 = arith.constant 0 : index
      %86 = vector.load %arg11[%c0_53, %c0_54] : memref<16x32xf32, #tpu.memory_space<vmem>>, vector<8x32xf32>
      tpu.vector_store %arg11[%c0_53, %c0_54], %85 {strides = array<i32>} : memref<16x32xf32, #tpu.memory_space<vmem>>, vector<8x32xf32>,
    } else {
    }
    %c8 = arith.constant 8 : index
    %c0_5 = arith.constant 0 : index
    %8 = vector.load %arg11[%c8, %c0_5] : memref<16x32xf32, #tpu.memory_space<vmem>>, vector<8x32xf32>
    tpu.vector_store %arg11[%c8, %c0_5], %1 {strides = array<i32>} : memref<16x32xf32, #tpu.memory_space<vmem>>, vector<8x32xf32>,
    %c0_6 = arith.constant 0 : index
    %c0_7 = arith.constant 0 : index
    %9 = vector.load %arg5[%c0_6, %c0_7] : memref<1x32xf32, #tpu.memory_space<vmem>>, vector<1x32xf32>
    %c0_8 = arith.constant 0 : index
    %c0_9 = arith.constant 0 : index
    %10 = vector.load %arg4[%c0_8, %c0_9] : memref<8x32xf32, #tpu.memory_space<vmem>>, vector<1x32xf32>
    %11 = arith.addf %9, %10 : vector<1x32xf32>
    %12 = vector.broadcast %11 : vector<1x32xf32> to vector<8x32xf32>
    %13 = arith.mulf %1, %12 : vector<8x32xf32>
    %c7 = arith.constant 7 : index
    %c0_10 = arith.constant 0 : index
    %14 = vector.load %arg11[%c7, %c0_10] : memref<16x32xf32, #tpu.memory_space<vmem>>, vector<8x32xf32>
    %c1 = arith.constant 1 : index
    %c0_11 = arith.constant 0 : index
    %15 = vector.load %arg4[%c1, %c0_11] : memref<8x32xf32, #tpu.memory_space<vmem>>, vector<1x32xf32>
    %16 = vector.broadcast %15 : vector<1x32xf32> to vector<8x32xf32>
    %17 = arith.mulf %14, %16 : vector<8x32xf32>
    %18 = arith.addf %13, %17 : vector<8x32xf32>
    %c6 = arith.constant 6 : index
    %c0_12 = arith.constant 0 : index
    %19 = vector.load %arg11[%c6, %c0_12] : memref<16x32xf32, #tpu.memory_space<vmem>>, vector<8x32xf32>
    %c2 = arith.constant 2 : index
    %c0_13 = arith.constant 0 : index
    %20 = vector.load %arg4[%c2, %c0_13] : memref<8x32xf32, #tpu.memory_space<vmem>>, vector<1x32xf32>
    %21 = vector.broadcast %20 : vector<1x32xf32> to vector<8x32xf32>
    %22 = arith.mulf %19, %21 : vector<8x32xf32>
    %23 = arith.addf %18, %22 : vector<8x32xf32>
    %c5 = arith.constant 5 : index
    %c0_14 = arith.constant 0 : index
    %24 = vector.load %arg11[%c5, %c0_14] : memref<16x32xf32, #tpu.memory_space<vmem>>, vector<8x32xf32>
    %c3 = arith.constant 3 : index
    %c0_15 = arith.constant 0 : index
    %25 = vector.load %arg4[%c3, %c0_15] : memref<8x32xf32, #tpu.memory_space<vmem>>, vector<1x32xf32>
    %26 = vector.broadcast %25 : vector<1x32xf32> to vector<8x32xf32>
    %27 = arith.mulf %24, %26 : vector<8x32xf32>
    %28 = arith.addf %23, %27 : vector<8x32xf32>
    %c4 = arith.constant 4 : index
    %c0_16 = arith.constant 0 : index
    %29 = vector.load %arg11[%c4, %c0_16] : memref<16x32xf32, #tpu.memory_space<vmem>>, vector<8x32xf32>
    %c4_17 = arith.constant 4 : index
    %c0_18 = arith.constant 0 : index
    %30 = vector.load %arg4[%c4_17, %c0_18] : memref<8x32xf32, #tpu.memory_space<vmem>>, vector<1x32xf32>
    %31 = vector.broadcast %30 : vector<1x32xf32> to vector<8x32xf32>
    %32 = arith.mulf %29, %31 : vector<8x32xf32>
    %33 = arith.addf %28, %32 : vector<8x32xf32>
    %c3_19 = arith.constant 3 : index
    %c0_20 = arith.constant 0 : index
    %34 = vector.load %arg11[%c3_19, %c0_20] : memref<16x32xf32, #tpu.memory_space<vmem>>, vector<8x32xf32>
    %c5_21 = arith.constant 5 : index
    %c0_22 = arith.constant 0 : index
    %35 = vector.load %arg4[%c5_21, %c0_22] : memref<8x32xf32, #tpu.memory_space<vmem>>, vector<1x32xf32>
    %36 = vector.broadcast %35 : vector<1x32xf32> to vector<8x32xf32>
    %37 = arith.mulf %34, %36 : vector<8x32xf32>
    %38 = arith.addf %33, %37 : vector<8x32xf32>
    %c2_23 = arith.constant 2 : index
    %c0_24 = arith.constant 0 : index
    %39 = vector.load %arg11[%c2_23, %c0_24] : memref<16x32xf32, #tpu.memory_space<vmem>>, vector<8x32xf32>
    %c6_25 = arith.constant 6 : index
    %c0_26 = arith.constant 0 : index
    %40 = vector.load %arg4[%c6_25, %c0_26] : memref<8x32xf32, #tpu.memory_space<vmem>>, vector<1x32xf32>
    %41 = vector.broadcast %40 : vector<1x32xf32> to vector<8x32xf32>
    %42 = arith.mulf %39, %41 : vector<8x32xf32>
    %43 = arith.addf %38, %42 : vector<8x32xf32>
    %c1_27 = arith.constant 1 : index
    %c0_28 = arith.constant 0 : index
    %44 = vector.load %arg11[%c1_27, %c0_28] : memref<16x32xf32, #tpu.memory_space<vmem>>, vector<8x32xf32>
    %c7_29 = arith.constant 7 : index
    %c0_30 = arith.constant 0 : index
    %45 = vector.load %arg4[%c7_29, %c0_30] : memref<8x32xf32, #tpu.memory_space<vmem>>, vector<1x32xf32>
    %46 = vector.broadcast %45 : vector<1x32xf32> to vector<8x32xf32>
    %47 = arith.mulf %44, %46 : vector<8x32xf32>
    %48 = arith.addf %43, %47 : vector<8x32xf32>
    %cst = arith.constant 5.000000e-01 : f32
    %49 = vector.broadcast %cst : f32 to vector<8x32xf32>
    %50 = arith.mulf %49, %48 : vector<8x32xf32>
    %51 = arith.mulf %48, %48 : vector<8x32xf32>
    %52 = arith.mulf %51, %48 : vector<8x32xf32>
    %cst_31 = arith.constant 4.471500e-02 : f32
    %53 = vector.broadcast %cst_31 : f32 to vector<8x32xf32>
    %54 = arith.mulf %53, %52 : vector<8x32xf32>
    %55 = arith.addf %48, %54 : vector<8x32xf32>
    %cst_32 = arith.constant 0.797884583 : f32
    %56 = vector.broadcast %cst_32 : f32 to vector<8x32xf32>
    %57 = arith.mulf %56, %55 : vector<8x32xf32>
    %58 = math.tanh %57 : vector<8x32xf32>
    %cst_33 = arith.constant 1.000000e+00 : f32
    %59 = vector.broadcast %cst_33 : f32 to vector<8x32xf32>
    %60 = arith.addf %59, %58 : vector<8x32xf32>
    %61 = arith.mulf %50, %60 : vector<8x32xf32>
    %62 = arith.truncf %61 : vector<8x32xf32> to vector<8x32xbf16>
    %c0_34 = arith.constant 0 : index
    %c0_35 = arith.constant 0 : index
    %63 = vector.load %arg6[%c0_34, %c0_35] : memref<32x32xbf16, #tpu.memory_space<vmem>>, vector<32x32xbf16>
    %cst_36 = arith.constant dense<0.000000e+00> : vector<8x32xf32>
    %64 = tpu.matmul %62, %63, %cst_36 {dimension_numbers = #tpu.dot_dimension_numbers<[1], [0], [0], [1], [0, 0, 1, 1], [], []>} : vector<8x32xbf16>, vector<32x32xbf16>, vector<8x32xf32> -> vector<8x32xf32>
    %c0_37 = arith.constant 0 : index
    %c0_38 = arith.constant 0 : index
    %65 = vector.load %arg8[%c0_37, %c0_38] : memref<1x32xf32, #tpu.memory_space<vmem>>, vector<1x32xf32>
    %66 = vector.broadcast %65 : vector<1x32xf32> to vector<8x32xf32>
    %67 = arith.addf %64, %66 : vector<8x32xf32>
    %c0_39 = arith.constant 0 : index
    %c0_40 = arith.constant 0 : index
    %68 = vector.load %arg7[%c0_39, %c0_40] : memref<32x32xbf16, #tpu.memory_space<vmem>>, vector<32x32xbf16>
    %cst_41 = arith.constant dense<0.000000e+00> : vector<8x32xf32>
    %69 = tpu.matmul %62, %68, %cst_41 {dimension_numbers = #tpu.dot_dimension_numbers<[1], [0], [0], [1], [0, 0, 1, 1], [], []>} : vector<8x32xbf16>, vector<32x32xbf16>, vector<8x32xf32> -> vector<8x32xf32>
    %c0_42 = arith.constant 0 : index
    %c0_43 = arith.constant 0 : index
    %70 = vector.load %arg9[%c0_42, %c0_43] : memref<1x32xf32, #tpu.memory_space<vmem>>, vector<1x32xf32>
    %71 = vector.broadcast %70 : vector<1x32xf32> to vector<8x32xf32>
    %72 = arith.addf %69, %71 : vector<8x32xf32>
    %cst_44 = arith.constant 5.000000e-01 : f32
    %73 = vector.broadcast %cst_44 : f32 to vector<8x32xf32>
    %74 = arith.mulf %73, %72 : vector<8x32xf32>
    %75 = math.tanh %74 : vector<8x32xf32>
    %cst_45 = arith.constant 5.000000e-01 : f32
    %76 = vector.broadcast %cst_45 : f32 to vector<8x32xf32>
    %77 = arith.mulf %76, %75 : vector<8x32xf32>
    %cst_46 = arith.constant 5.000000e-01 : f32
    %78 = vector.broadcast %cst_46 : f32 to vector<8x32xf32>
    %79 = arith.addf %78, %77 : vector<8x32xf32>
    %80 = arith.mulf %67, %79 : vector<8x32xf32>
    %c0_47 = arith.constant 0 : index
    %c0_48 = arith.constant 0 : index
    %c0_49 = arith.constant 0 : index
    %81 = vector.load %arg10[%c0_47, %c0_48, %c0_49] : memref<1x8x32xf32, #tpu.memory_space<vmem>>, vector<1x8x32xf32>
    %82 = vector.shape_cast %81 : vector<1x8x32xf32> to vector<8x32xf32>
    %83 = vector.shape_cast %80 : vector<8x32xf32> to vector<1x8x32xf32>
    tpu.vector_store %arg10[%c0_47, %c0_48, %c0_49], %83 {strides = array<i32>} : memref<1x8x32xf32, #tpu.memory_space<vmem>>, vector<1x8x32xf32>,
    return
  }
  func.func @transform_0(%arg0: i32, %arg1: i32) -> (i32, i32, i32) {
    %c0_i32 = arith.constant 0 : i32
    %c0_i32_0 = arith.constant 0 : i32
    return %arg0, %arg1, %c0_i32 : i32, i32, i32
  }
  func.func @transform_1(%arg0: i32, %arg1: i32) -> (i32, i32, i32) {
    %c1_i32 = arith.constant 1 : i32
    %0 = arith.muli %arg1, %c1_i32 : i32
    %c1_i32_0 = arith.constant 1 : i32
    %1 = arith.subi %0, %c1_i32_0 : i32
    %c0_i32 = arith.constant 0 : i32
    %2 = arith.maxsi %1, %c0_i32 : i32
    %c0_i32_1 = arith.constant 0 : i32
    %c0_i32_2 = arith.constant 0 : i32
    return %arg0, %2, %c0_i32_1 : i32, i32, i32
  }
  func.func @transform_2(%arg0: i32, %arg1: i32) -> (i32, i32) {
    %c0_i32 = arith.constant 0 : i32
    %c0_i32_0 = arith.constant 0 : i32
    %c0_i32_1 = arith.constant 0 : i32
    return %c0_i32, %c0_i32_0 : i32, i32
  }
  func.func @transform_3(%arg0: i32, %arg1: i32) -> (i32, i32) {
    %c0_i32 = arith.constant 0 : i32
    %c0_i32_0 = arith.constant 0 : i32
    %c0_i32_1 = arith.constant 0 : i32
    return %c0_i32, %c0_i32_0 : i32, i32
  }
  func.func @transform_4(%arg0: i32, %arg1: i32) -> (i32, i32) {
    %c0_i32 = arith.constant 0 : i32
    %c0_i32_0 = arith.constant 0 : i32
    %c0_i32_1 = arith.constant 0 : i32
    return %c0_i32, %c0_i32_0 : i32, i32
  }
  func.func @transform_5(%arg0: i32, %arg1: i32) -> (i32, i32) {
    %c0_i32 = arith.constant 0 : i32
    %c0_i32_0 = arith.constant 0 : i32
    %c0_i32_1 = arith.constant 0 : i32
    return %c0_i32, %c0_i32_0 : i32, i32
  }
  func.func @transform_6(%arg0: i32, %arg1: i32) -> (i32, i32) {
    %c0_i32 = arith.constant 0 : i32
    %c0_i32_0 = arith.constant 0 : i32
    %c0_i32_1 = arith.constant 0 : i32
    return %c0_i32, %c0_i32_0 : i32, i32
  }
  func.func @transform_7(%arg0: i32, %arg1: i32) -> (i32, i32) {
    %c0_i32 = arith.constant 0 : i32
    %c0_i32_0 = arith.constant 0 : i32
    %c0_i32_1 = arith.constant 0 : i32
    return %c0_i32, %c0_i32_0 : i32, i32
  }
  func.func @transform_8(%arg0: i32, %arg1: i32) -> (i32, i32, i32) {
    %c0_i32 = arith.constant 0 : i32
    %c0_i32_0 = arith.constant 0 : i32
    return %arg0, %arg1, %c0_i32 : i32, i32, i32
  }
}

</mosaic_0001>

<bundles_post_ra>
// kernel: tpu_custom_call.1
= control target key start
LH: loop header
LB: loop body
LE: loop exit
PB: predicated region body
PF: predicated region fallthrough
CT: control target
= control target key end

     0   :  { %s1664_s0 = inlined_call_operand.hbm [shape: f32[2,16,32], index: 0, kind: input, shape index: {}]   ;;  %s1665_s1 = inlined_call_operand.hbm [shape: f32[2,16,32], index: 1, kind: input, shape index: {}]   ;;  %s1666_s2 = inlined_call_operand.hbm [shape: f32[8,32], index: 2, kind: input, shape index: {}]   ;;  %s1667_s3 = inlined_call_operand.vmem [shape: f32[1,32], index: 3, kind: input, shape index: {}]   ;;  %s1668_s4 = inlined_call_operand.hbm [shape: bf16[32,32], index: 4, kind: input, shape index: {}]   ;;  %s1669_s5 = inlined_call_operand.hbm [shape: bf16[32,32], index: 5, kind: input, shape index: {}]   ;;  %s1670_s6 = inlined_call_operand.vmem [shape: f32[1,32], index: 6, kind: input, shape index: {}]   ;;  %s1671_s7 = inlined_call_operand.vmem [shape: f32[1,32], index: 7, kind: input, shape index: {}]   ;;  %s1672_s8 = inlined_call_operand.hbm [shape: f32[2,16,32], index: 8, kind: output, shape index: {}]  }
   0x1   :  { %1687 = sst [smem:[#allocation25_spill]] %s1666_s2 }
   0x2   :  { %1688 = sst [smem:[#allocation26_spill]] %s1668_s4 }
   0x3   :  { %1689 = sst [smem:[#allocation27_spill]] %s1669_s5 }
   0x4   :  { %1690 = sst [smem:[#allocation28_spill]] %s1670_s6 }
   0x5   :  { %1691 = sst [smem:[#allocation29_spill]] %s1672_s8 }
   0x6   :  { %13 = vsyncpa [#allocation4], 0 }
   0x7   :  { %15 = vsyncpa [#allocation4 + $0x1], 0 }
   0x8   :  { %16 = vsyncpa [#allocation7], 0 }
   0x9   :  { %18 = vsyncpa [#allocation7 + $0x1], 0 }
   0xa   :  { %19 = vsyncpa [#allocation10], 0 }
   0xb   :  { %20 = vsyncpa [#allocation5], 0 }
   0xc   :  { %22 = vsyncpa [#allocation5 + $0x1], 0  ;;  %s1358_s27 = smov 0   ;;  %s1360_s28 = smov 0  }
   0xd   :  { %s1362_s29 = smov 0   ;;  %s1364_s30 = smov 0  }
   0xe   :  { %s1366_s9 = smov 0   ;;  %s1368_s10 = smov 0  }
   0xf   :  { %s1370_s11 = smov 0   ;;  %s1372_s12 = smov 0  }
  0x10   :  { %s1374_s13 = smov 0   ;;  %s1376_s14 = smov 0  }
  0x11   :  { %s1378_s15 = smov 0  }
  0x12 LB: > { %1692 = sst [smem:[#allocation18_spill]] %s1272_s30  ;;  %s1414_s16 = sadd.s32 4294967295, %s1300_s15   ;;  %s1300_s15 = sphi %s1378_s15, %s28_s15   ;;  %s1296_s14 = sphi %s1376_s14, %s1742_s14   ;;  %s1292_s13 = sphi %s1374_s13, %s1741_s13   ;;  %s1288_s12 = sphi %s1372_s12, %s1740_s12   ;;  %s1284_s11 = sphi %s1370_s11, %s1739_s11   ;;  %s1280_s10 = sphi %s1368_s10, %s1731_s10   ;;  %s1276_s9 = sphi %s1366_s9, %s1738_s9   ;;  %s1272_s30 = sphi %s1364_s30, %s1737_s30   ;;  %s1268_s29 = sphi %s1362_s29, %s1736_s29   ;;  %s1264_s28 = sphi %s1360_s28, %s1735_s28   ;;  %s1260_s27 = sphi %s1358_s27, %s1734_s27  }
  0x13   : > { %1693 = sst [smem:[#allocation19_spill]] %s1280_s10  ;;  %p819_p0 = scmp.ge.s32.totalorder %s1300_s15, 1 }
  0x14   : > { %p1673_p1 = scmp.eq.s32.totalorder %s1414_s16, 0  ;;  %p261_p2 = scmp.lt.s32.totalorder %s1300_s15, 5 }
  0x15   : > { %s1302_s18 = smov [#allocation8]   ;;  %s1303_s20 = smov [#allocation9]  }
  0x16   : > { %p1419_p3 = pnand %p819_p0, %p261_p2  ;;  %s274_s19 = sshll.u32 %s1302_s18, 4  ;;  %s275_s19 = int_to_ptr.vmem [resolvable:$true] %s274_s19 }
  0x17   : > { %s287_s21 = sshll.u32 %s1303_s20, 4  ;;  %s1304_s23 = smov [#allocation11]   ;;  %s288_s21 = int_to_ptr.vmem [resolvable:$true] %s287_s21 }
  0x18   : > { %s1694_s17 = scalar_select %p1419_p3, 1, 0 }
  0x19   : > { %p900_p4 = pneg %p1419_p3  ;;  %s300_s24 = sshll.u32 %s1304_s23, 4  ;;  %s301_s24 = int_to_ptr.vmem [resolvable:$true] %s300_s24 }
  0x1a   : > { %s1044_s25 = scalar_lea.vmem %s275_s19, 128  ;;  %p1052_p10 = scmp.lt.s32.totalorder %s275_s19, %s275_s19 }
  0x1b   : > { %p1427_p5 = pnand %p900_p4, %p1673_p1  ;;  %p1045_p7 = scmp.ne.s32.totalorder %s275_s19, %s1044_s25 }
  0x1c   : > { %p1053_p11 = scmp.lt.s32.totalorder %s1044_s25, %s1044_s25 }
  0x1d   : > { %p1035_p6 = pneg %p1427_p5 }
  0x1e   : > { %p1054_p12 = por %p1053_p11, %p1052_p10 }
  0x1f   : > { %p1047_p8 = pnand %p1045_p7, %p1035_p6 }
  0x21   : > { %p1048_p9 = pneg %p1047_p8 }
  0x23   : > { %p1055_p13 = pnand %p1054_p12, %p1048_p9 }
  0x25   : > { %1058 = shalt.err (!%p1055_p13)
}
  0x26   : > { %s1696_s2 = sld [smem:[#allocation25_spill]]  ;;  %s1070_s20 = scalar_lea.vmem %s288_s21, 256 }
  0x27   : > { %p1071_p0 = scmp.ne.s32.totalorder %s288_s21, %s1070_s20  ;;  %p1078_p7 = scmp.lt.s32.totalorder %s288_s21, %s288_s21 }
  0x28   : > { %p1079_p8 = scmp.lt.s32.totalorder %s1070_s20, %s1070_s20 }
  0x29   : > { %p1073_p2 = pnand %p1071_p0, %p1035_p6 }
  0x2a   : > { %p1080_p1 = por %p1079_p8, %p1078_p7 }
  0x2b   : > { %p1074_p4 = pneg %p1073_p2 }
  0x2c   : > { %903 = dma.hbm_to_vmem [thread:$0]  (!%p1427_p5), %s1696_s2, 128, %s275_s19, [#allocation7]  }
  0x2d   : > { %p1081_p3 = pnand %p1080_p1, %p1074_p4 }
  0x2f   : > { %1084 = shalt.err (!%p1081_p3)
}
  0x30   : > { %s1305_s23 = smov 64   ;;  %s1306_s25 = smov 4  }
  0x31   : > { %s1697_s4 = sld [smem:[#allocation26_spill]]  ;;  %s1096_s19 = scalar_lea.vmem %s301_s24, 256 }
  0x32   : > { %p1097_p9 = scmp.ne.s32.totalorder %s301_s24, %s1096_s19  ;;  %p1104_p12 = scmp.lt.s32.totalorder %s301_s24, %s301_s24 }
  0x33   : > { %p1105_p13 = scmp.lt.s32.totalorder %s1096_s19, %s1096_s19 }
  0x34   : > { %p1099_p10 = pnand %p1097_p9, %p1035_p6 }
  0x35   : > { %p1106_p1 = por %p1105_p13, %p1104_p12 }
  0x36   : > { %p1100_p11 = pneg %p1099_p10 }
  0x37   : > { %906 = dma.hbm_to_vmem [thread:$0]  (!%p1427_p5), %s1697_s4, 256, %s288_s21, [#allocation10], %s1305_s23, %s1305_s23, %s1306_s25  }
  0x38   : > { %p1107_p3 = pnand %p1106_p1, %p1100_p11 }
  0x3a   : > { %1110 = shalt.err (!%p1107_p3)
}
  0x3b   : > { %s1698_s5 = sld [smem:[#allocation27_spill]]  ;;  %s816_s8 = sadd.s32 4294967294, %s1300_s15  }
  0x3c   : > { %s37_s21 = sadd.s32 1, %s1292_s13  ;;  %s40_s22 = sadd.s32 1, %s1296_s14 }
  0x3d   : > { %p38_p6 = scmp.ge.s32.totalorder %s37_s21, 2  ;;  %s49_s26 = sadd.s32 1, %s1280_s10 }
  0x3e   : > { %p56_p0 = scmp.ne.s32.totalorder %s1280_s10, %s1276_s9  ;;  %p1683_p2 = scmp.eq.s32.totalorder %s1300_s15, 0 }
  0x3f   : > { %s1744_s21 = smov (%p38_p6, %s37_s21), 0  ;;  %s1746_s22 = smov (!%p38_p6, %s40_s22), %s1296_s14 }
  0x40   : > { %1699 = sst [smem:[#allocation20_spill]] %s1744_s21  ;;  %s45_s19 = ssub.s32 %s1292_s13, %s1744_s21 }
  0x41   : > { %909 = dma.hbm_to_vmem [thread:$0]  (!%p1427_p5), %s1698_s5, 256, %s301_s24, [#allocation10], %s1305_s23, %s1305_s23, %s1306_s25  }
  0x42   : > { %p1474_p5 = por %p1683_p2, %p56_p0  ;;  %p42_p4 = scmp.ge.s32.totalorder %s1746_s22, 2 }
  0x43   : > { %p62_p7 = scmp.ne.s32.totalorder %s1276_s9, %s1272_s30  ;;  %p1702_p8 = scmp.eq.s32.totalorder %s1414_s16, 0 }
  0x44   : > { %s1748_s22 = smov (%p42_p4, %s1746_s22), 0  ;;  %p248_p10 = scmp.eq.s32.totalorder %s1414_s16, 3 }
  0x45   : > { %1701 = sst [smem:[#allocation21_spill]] %s1748_s22  ;;  %p1484_p9 = por %p1702_p8, %p62_p7 }
  0x46   : > { %s1490_s25 = ssub.s32 %s1296_s14, %s1748_s22  ;;  %p254_p12 = scmp.eq.s32.totalorder %s816_s8, 3 }
  0x47   : > { %s1703_s23 = scalar_select %p1484_p9, 1, 0 }
  0x48   : > { %s46_s18 = sor.u32 %s45_s19, %s1490_s25  ;;  %p1500_p13 = por %p248_p10, %p56_p0 }
  0x49   : > { %p47_p11 = scmp.eq.s32.totalorder %s46_s18, 0  ;;  %p1504_p1 = por %p254_p12, %p62_p7 }
  0x4a   : > { %s1705_s2 = scalar_select %p1500_p13, 1, 0 }
  0x4b   : > { %s1495_s20 = scalar_select %p47_p11, %s1280_s10, %s49_s26  }
  0x4c   : > { %1706 = sst [smem:[#allocation23_spill]] %s1705_s2  ;;  %p924_p3 = scmp.lt.s32.totalorder %s1300_s15, 4 }
  0x4d   : > { %1704 = sst [smem:[#allocation22_spill]] %s1495_s20  ;;  %s320_s5 = sand.u32 1, %s1280_s10  }
  0x4e   : > { %s1707_s4 = scalar_select %p1504_p1, 1, 0 }
  0x4f   : > { %s824_s19 = sshll.u32 %s320_s5, 3  ;;  %s825_s22 = sshll.u32 %s1296_s14, 1 }
  0x50   : > { %1708 = sst [smem:[#allocation24_spill]] %s1707_s4  ;;  %s329_s18 = sadd.s32 %s1292_s13, %s825_s22 }
  0x51   : > { %s826_s21 = sshll.u32 %s329_s18, 7  ;;  %s324_s30 = scalar_lea.vmem [#allocation3], %s824_s19 }
  0x52   : > { %s333_s8 = sshll.u32 %s324_s30, 4  ;;  %s331_s6 = scalar_lea.hbm %s1664_s0, %s826_s21  ;;  %s334_s8 = int_to_ptr.vmem [resolvable:$true] %s333_s8 }
  0x53   : > { %p1520_p0 = pnand %p924_p3, %p1474_p5  ;;  %s321_s10 = scalar_lea.sflag [#allocation4], %s320_s5 }
  0x54   : > { %s1124_s4 = scalar_lea.vmem %s334_s8, 128  ;;  %s1307_s30 = smov [#allocation3]  }
  0x55   : > { %p1113_p4 = pneg %p1520_p0  ;;  %p1125_p7 = scmp.ne.s32.totalorder %s334_s8, %s1124_s4 }
  0x56   : > { %s1129_s22 = sshll.u32 %s1307_s30, 4  ;;  %s1130_s22 = int_to_ptr.vmem [resolvable:$false] %s1129_s22 }
  0x57   : > { %p1127_p8 = pnand %p1125_p7, %p1113_p4  ;;  %s1131_s20 = scalar_lea.vmem %s1130_s22, 256 }
  0x58   : > { %p1132_p11 = scmp.lt.s32.totalorder %s334_s8, %s1130_s22  ;;  %p1133_p12 = scmp.lt.s32.totalorder %s1131_s20, %s1124_s4 }
  0x59   : > { %p1128_p10 = pneg %p1127_p8 }
  0x5a   : > { %p1134_p2 = por %p1133_p12, %p1132_p11 }
  0x5c   : > { %p1135_p6 = pnand %p1134_p2, %p1128_p10 }
  0x5e   : > { %1138 = shalt.err (!%p1135_p6)
}
  0x5f   : > { %913 = dma.hbm_to_vmem [thread:$0]  (!%p1520_p0), %s331_s6, 128, %s334_s8, %s321_s10  }
  0x60   : > { %s83_s4 = sadd.s32 1, %s1268_s29  ;;  %p1710_p5 = scmp.eq.s32.totalorder %s1490_s25, 0 }
  0x61   : > { %p90_p2 = scmp.ne.s32.totalorder %s1268_s29, %s1264_s28  ;;  %p96_p6 = scmp.ne.s32.totalorder %s1264_s28, %s1260_s27 }
  0x62   : > { %s1532_s5 = scalar_select %p1710_p5, %s1268_s29, %s83_s4  }
  0x63   : > { %s340_s2 = sand.u32 1, %s1300_s15   ;;  %s342_s21 = sand.u32 1, %s1268_s29  }
  0x64   : > { %p1711_p4 = scmp.eq.s32.totalorder %s1300_s15, 0  ;;  %p1712_p8 = scmp.eq.s32.totalorder %s1414_s16, 0 }
  0x65   : > { %s827_s19 = sshll.u32 %s342_s21, 3  ;;  %s1257_s18 = sshll.u32 %s1296_s14, 8 }
  0x66   : > { %p92_p7 = por %p90_p2, %p1711_p4  ;;  %p1544_p10 = por %p96_p6, %p1712_p8 }
  0x67   : > { %s354_s6 = scalar_lea.hbm %s1665_s1, %s1257_s18  ;;  %s344_s10 = scalar_lea.vmem [#allocation6], %s827_s19 }
  0x68   : > { %s1713_s24 = scalar_select %p1544_p10, 1, 0 }
  0x69   : > { %s356_s25 = sshll.u32 %s344_s10, 4  ;;  %p1554_p0 = pnand %p924_p3, %p92_p7  ;;  %s357_s25 = int_to_ptr.vmem [resolvable:$true] %s356_s25 }
  0x6a   : > { %s341_s8 = scalar_lea.sflag [#allocation7], %s340_s2  ;;  %s1139_s22 = scalar_lea.hbm %s354_s6, 128 }
  0x6b   : > { %p1140_p11 = scmp.ne.s32.totalorder %s354_s6, %s1139_s22  ;;  %p1141_p12 = pneg %p1554_p0 }
  0x6c   : > { %p1145_p6 = scmp.lt.s32.totalorder %s354_s6, %s1665_s1 }
  0x6d   : > { %p1142_p5 = pnand %p1141_p12, %p1140_p11 }
  0x6f   : > { %p1143_p2 = pneg %p1142_p5 }
  0x71   : > { %p1148_p4 = pnand %p1145_p6, %p1143_p2 }
  0x73   : > { %1151 = shalt.err (!%p1148_p4)
}
  0x74   : > { %s1152_s21 = scalar_lea.vmem %s357_s25, 128  ;;  %s1308_s19 = smov [#allocation6]  }
  0x75   : > { %p1153_p8 = scmp.ne.s32.totalorder %s357_s25, %s1152_s21  ;;  %s1157_s18 = sshll.u32 %s1308_s19, 4  ;;  %s1158_s18 = int_to_ptr.vmem [resolvable:$false] %s1157_s18 }
  0x76   : > { %s1159_s2 = scalar_lea.vmem %s1158_s18, 256  ;;  %p1160_p1 = scmp.lt.s32.totalorder %s357_s25, %s1158_s18 }
  0x77   : > { %p1155_p3 = pnand %p1153_p8, %p1141_p12  ;;  %p1161_p13 = scmp.lt.s32.totalorder %s1159_s2, %s1152_s21 }
  0x79   : > { %p1156_p7 = pneg %p1155_p3  ;;  %p1162_p10 = por %p1161_p13, %p1160_p1 }
  0x7b   : > { %p1163_p9 = pnand %p1162_p10, %p1156_p7 }
  0x7d   : > { %1166 = shalt.err (!%p1163_p9)
}
  0x7e   : > { %916 = dma.hbm_to_vmem [thread:$0]  (!%p1554_p0), %s354_s6, 128, %s357_s25, %s341_s8  }
  0x7f   : > { %p1715_p11 = scmp.ne.s32.totalorder %s1694_s17, 0 }
  0x80   : > { %s1568_s26 = sand.u32 (!%p1715_p11), 1, %s1276_s9   ;;  %p1716_p12 = scmp.ne.s32.totalorder (!%p1715_p11), %s1703_s23, 0 }
  0x81   : > { %365 = sbr.rel (%p1715_p11) target bundleno = 450 (0x1c2), region = 52  ;;  %s832_s30 = sshll.u32 (!%p1715_p11), %s1568_s26, 3 }
  0x82   : > { %s368_s10 = scalar_lea.sflag (!%p1715_p11), [#allocation4], %s1568_s26  ;;  %s371_s22 = scalar_lea.vmem (!%p1715_p11), [#allocation3], %s832_s30 }
  0x86   : > { %1238 = dma.done.wait (%p1716_p12), %s368_s10, 128  }
  0x87   : > { %1240 = vsyncadd (%p1716_p12), %s368_s10, 4294967168  ;;  %s376_s6 = sand.u32 1, %s1414_s16   ;;  %s378_s17 = sand.u32 1, %s1264_s28  }
  0x88   : > { %s833_s25 = sshll.u32 %s378_s17, 3  ;;  %s377_s27 = scalar_lea.sflag [#allocation7], %s376_s6 }
  0x89   : > { %s380_s8 = scalar_lea.vmem [#allocation6], %s833_s25  ;;  %p1717_p9 = scmp.ne.s32.totalorder %s1713_s24, 0 }
  0x8b   : > { %1242 = dma.done.wait (%p1717_p9), %s377_s27, 128  }
  0x8c   : > { %1244 = vsyncadd (%p1717_p9), %s377_s27, 4294967168  ;;  %p1718_p13 = scmp.eq.s32.totalorder %s1414_s16, 0 }
  0x8e   : > { %1246 = dma.done.wait (%p1718_p13), [#allocation7], 128   ;;  %p1719_p1 = pmov %p1718_p13 }
  0x90   : > { %1248 = vsyncadd (%p1719_p1), [#allocation7], 4294967168  ;;  %p1720_p10 = pmov %p1719_p1 }
  0x91   : > { %p1721_p0 = pmov %p1719_p1 }
  0x92   : > { %1250 = dma.done.wait (%p1720_p10), [#allocation10], 512  }
  0x93   : > { %1252 = vsyncadd (%p1721_p0), [#allocation10], 4294966784  ;;  %v434_v0 = vld [vmem:[%s371_s22] sm:$0xff]  ;;  %s1590_s23 = scalar_lea.vmem [#allocation12], %s832_s30  ;;  %p838_p5 = scmp.ne.s32.totalorder %s1284_s11, 0 }
  0x95   : > { %438 = sbr.rel (%p838_p5) target bundleno = 156 (0x9c), region = 76 }
  0x9a   : > { %vm439_vm0 = vcmask 261120   ;;  %v1309_v1 = vmov 0.0  }
  0x9b   : > { %440 = vst.msk [vmem:[#allocation2] sm:$0xff] %vm439_vm0, %v1309_v1 }
  0x9c PF: > { %p839_p2 = scmp.le.s32.totalorder %s1284_s11, 0 }
  0x9e   : > { %444 = sbr.rel (%p839_p2) target bundleno = 165 (0xa5), region = 80 }
  0xa3   : > { %v445_v2 = vld [vmem:[%s380_s8] sm:$0xff]  ;;  %vm446_vm1 = vcmask 261120  }
  0xa4   : > { %447 = vst.msk [vmem:[#allocation2] sm:$0xff] %vm446_vm1, %v445_v2 }
  0xa5 PF: > { %v1025_v3 = vld [vmem:[#allocation11 + $0x8] sm:$0xff]   ;;  %v454_v4 = vlaneseq  ;;  %v1310_v5 = vmov 0.0   ;;  %v1026_v6 = vld [vmem:[#allocation11] sm:$0xff]   ;;  %vm1311_vm2 = vmmov 0   ;;  %vm448_vm3 = vcmask 261120   ;;  %v1027_v12 = vld [vmem:[#allocation9 + $0x8] sm:$0xff]  }
  0xa6   : > { %874 = vmatprep.subr.bf16.mxu1 %v1310_v5  ;;  %866 = vmatprep.subr.bf16.mxu0 %v1310_v5  ;;  %v450_v7 = vld [vmem:[%s1667_s3] sm:$0x1]  ;;  %v451_v8 = vld [vmem:[#allocation8] sm:$0x1]  ;;  %449 = vst.msk [vmem:[#allocation2 + $0x8] sm:$0xff] %vm448_vm3, %v434_v0  ;;  %v1028_v14 = vld [vmem:[#allocation9] sm:$0xff]  }
  0xa7   : > { %875 = vmatpush3.bf16.msra.mxu1 %v1025_v3  ;;  %878 = vmatprep.mubr.msk.bf16.mxu1 %vm1311_vm2, %v1310_v5  ;;  %v455_v9 = vshrl.u32 %v454_v4, 7  ;;  %v452_v10 = vadd.f32 %v451_v8, %v450_v7  ;;  %v840_v15 = vld [vmem:[#allocation8 + $0x1] ss:$0 sm:$0xff]  ;;  %v841_v16 = vld [vmem:[#allocation8 + $0x2] ss:$0 sm:$0xff]  ;;  %s856_s21 = sshll.u32 %s1288_s12, 1 }
  0xa8   : > { %876 = vmatprep.subr.bf16.mxu1 %v1310_v5  ;;  %870 = vmatprep.mubr.msk.bf16.mxu0 %vm1311_vm2, %v1310_v5  ;;  %v842_v18 = vld [vmem:[#allocation8 + $0x3] ss:$0 sm:$0xff]  ;;  %v843_v25 = vld [vmem:[#allocation8 + $0x4] ss:$0 sm:$0xff]  ;;  %v844_v29 = vld [vmem:[#allocation8 + $0x5] ss:$0 sm:$0xff]  ;;  %s673_s10 = sadd.s32 %s1284_s11, %s856_s21 }
  0xa9   : > { %v456_v11 = vsub.s32 0, %v455_v9  ;;  %867 = vmatpush3.bf16.msra.mxu0 %v1027_v12  ;;  %v845_v33 = vld [vmem:[#allocation8 + $0x6] ss:$0 sm:$0xff]  ;;  %v846_v37 = vld [vmem:[#allocation8 + $0x7] ss:$0 sm:$0xff]  ;;  %s1722_s2 = sld [smem:[#allocation28_spill]] }
  0xaa   : > { %868 = vmatprep.subr.bf16.mxu0 %v1310_v5  ;;  %v851_v54 = vld [vmem:[%s1671_s7] ss:$0 sm:$0xff]  ;;  %s1723_s30 = sld [smem:[#allocation23_spill]]  ;;  %s857_s22 = sshll.u32 %s673_s10, 7 }
  0xab   : > { %877 = vmatpush3.bf16.msra.mxu1 %v1026_v6  ;;  %v457_v13 = vrot.slane %v452_v10, %v456_v11  ;;  %s677_s6 = sshll.u32 %s1590_s23, 4  ;;  %s1724_s27 = sld [smem:[#allocation29_spill]]  ;;  %s678_s6 = int_to_ptr.vmem [resolvable:$true] %s677_s6 }
  0xac   : > { %s662_s12 = scalar_lea.sflag [#allocation5], %s1568_s26  ;;  %s1167_s24 = scalar_lea.vmem %s678_s6, 128 }
  0xad   : > { %v459_v17 = vmul.f32 %v457_v13, %v434_v0  ;;  %v460_v19 = vld [vmem:[#allocation2 + $0x7] sm:$0xff]  ;;  %869 = vmatpush3.bf16.msra.mxu0 %v1028_v14  ;;  %p1168_p6 = scmp.ne.s32.totalorder %s678_s6, %s1167_s24  ;;  %s1312_s11 = smov [#allocation12]  }
  0xae   : > { %v468_v20 = vld [vmem:[#allocation2 + $0x6] sm:$0xff]  ;;  %v466_v22 = vmul.f32 %v840_v15, %v460_v19  ;;  %s1171_s20 = sshll.u32 %s1312_s11, 4  ;;  %s1172_s20 = int_to_ptr.vmem [resolvable:$false] %s1171_s20 }
  0xaf   : > { %v476_v21 = vld [vmem:[#allocation2 + $0x5] sm:$0xff]  ;;  %v474_v23 = vmul.f32 %v841_v16, %v468_v20  ;;  %v847_v1 = vld [vmem:[%s1722_s2] ss:$0 sm:$0xff]  ;;  %s1173_s4 = scalar_lea.vmem %s1172_s20, 256  ;;  %p1174_p7 = scmp.lt.s32.totalorder %s678_s6, %s1172_s20 }
  0xb0   : > { %v484_v24 = vld [vmem:[#allocation2 + $0x4] sm:$0xff]  ;;  %v467_v26 = vadd.f32 %v466_v22, %v459_v17  ;;  %v482_v27 = vmul.f32 %v842_v18, %v476_v21  ;;  %p1726_p4 = scmp.ne.s32.totalorder %s1723_s30, 0  ;;  %p1175_p11 = scmp.lt.s32.totalorder %s1173_s4, %s1167_s24 }
  0xb1   : > { %v492_v28 = vld [vmem:[#allocation2 + $0x3] sm:$0xff]  ;;  %v490_v31 = vmul.f32 %v843_v25, %v484_v24  ;;  %s1725_s8 = smov %s1724_s27  ;;  %s675_s16 = scalar_lea.hbm %s1724_s27, %s857_s22 }
  0xb2   : > { %v475_v30 = vadd.f32 %v474_v23, %v467_v26  ;;  %v500_v32 = vld [vmem:[#allocation2 + $0x2] sm:$0xff]  ;;  %v498_v35 = vmul.f32 %v844_v29, %v492_v28  ;;  %p1169_p8 = pnand %p1168_p6, %p1726_p4  ;;  %p1176_p12 = por %p1175_p11, %p1174_p7 }
  0xb3   : > { %v508_v36 = vld [vmem:[#allocation2 + $0x1] sm:$0xff]  ;;  %v506_v39 = vmul.f32 %v845_v33, %v500_v32 }
  0xb4   : > { %v483_v34 = vadd.f32 %v482_v27, %v475_v30  ;;  %v514_v41 = vmul.f32 %v846_v37, %v508_v36  ;;  %p1170_p3 = pneg %p1169_p8 }
  0xb6   : > { %v491_v38 = vadd.f32 %v490_v31, %v483_v34  ;;  %p1177_p9 = pnand %p1176_p12, %p1170_p3 }
  0xb8   : > { %v499_v40 = vadd.f32 %v498_v35, %v491_v38 }
  0xba   : > { %v507_v42 = vadd.f32 %v506_v39, %v499_v40 }
  0xbc   : > { %v515_v43 = vadd.f32 %v514_v41, %v507_v42 }
  0xbe   : > { %v517_v44 = vmul.f32 %v515_v43, %v515_v43  ;;  %v516_v49 = vmul.f32 0.5, %v515_v43 }
  0xc0   : > { %v518_v45 = vmul.f32 %v517_v44, %v515_v43 }
  0xc2   : > { %v519_v46 = vmul.f32 0.044715, %v518_v45 }
  0xc4   : > { %v520_v47 = vadd.f32 %v519_v46, %v515_v43 }
  0xc6   : > { %v521_v48 = vmul.f32 0.7978846, %v520_v47 }
  0xc8   : > { %1029 = vtanh.f32 %v521_v48 }
  0xd5   : > { %v1030_v50 = vpop.eup %1029 }
  0xd6   : > { %v523_v51 = vadd.f32 1.0, %v1030_v50 }
  0xd8   : > { %v524_v52 = vmul.f32 %v523_v51, %v516_v49 }
  0xda   : > { %v525_v53 = vpack.c.bf16 %v524_v52, %v524_v52 }
  0xdc   : > { %879 = vmatmul.mubr.msk.bf16.vlgmr.msra.gmra.mxu1 %vm448_vm3, %v525_v53  ;;  %871 = vmatmul.mubr.msk.bf16.vlgmr.msra.gmra.mxu0 %vm448_vm3, %v525_v53 }
 0x19c   : > { %v649_v55 = vpop.f32.mrf.mxu1  ;;  %v586_v56 = vpop.f32.mrf.mxu0 }
 0x19d   : > { %v650_v57 = vadd.f32 %v851_v54, %v649_v55  ;;  %v587_v3 = vadd.f32 %v847_v1, %v586_v56 }
 0x19e   : > { %v880_v58 = vpop.f32.mrf.mxu1  ;;  %v872_v59 = vpop.f32.mrf.mxu0 }
 0x19f   : > { %v655_v60 = vmul.f32 0.5, %v650_v57 }
 0x1a0   : > { %v652_v61 = vpop.f32.mrf.mxu1  ;;  %v589_v62 = vpop.f32.mrf.mxu0 }
 0x1a1   : > { %1031 = vtanh.f32 %v655_v60 }
 0x1a2   : > { %v881_v63 = vpop.f32.mrf.mxu1  ;;  %v873_v0 = vpop.f32.mrf.mxu0 }
 0x1ae   : > { %v1032_v2 = vpop.eup %1031 }
 0x1af   : > { %v657_v4 = vmul.f32 0.5, %v1032_v2 }
 0x1b1   : > { %v658_v5 = vadd.f32 0.5, %v657_v4 }
 0x1b3   : > { %v659_v6 = vmul.f32 %v658_v5, %v587_v3 }
 0x1b5   : > { %660 = vst.msk [vmem:[%s1590_s23] sm:$0xff] %vm448_vm3, %v659_v6 }
 0x1b6   : > { %1180 = shalt.err (!%p1177_p9)
}
 0x1b7   : > { %s1181_s21 = scalar_lea.hbm %s675_s16, 128  ;;  %s1185_s19 = scalar_lea.hbm %s1725_s8, 512 }
 0x1b8   : > { %p1182_p13 = scmp.ne.s32.totalorder %s675_s16, %s1181_s21  ;;  %p1186_p0 = scmp.lt.s32.totalorder %s675_s16, %s1725_s8 }
 0x1b9   : > { %p1187_p5 = scmp.lt.s32.totalorder %s1185_s19, %s1181_s21 }
 0x1ba   : > { %p1183_p1 = pnand %p1182_p13, %p1726_p4 }
 0x1bb   : > { %p1188_p2 = por %p1187_p5, %p1186_p0 }
 0x1bc   : > { %p1184_p10 = pneg %p1183_p1 }
 0x1be   : > { %p1189_p6 = pnand %p1188_p2, %p1184_p10 }
 0x1c0   : > { %1192 = shalt.err (!%p1189_p6)
}
 0x1c1   : > { %898 = dma.vmem_to_hbm [thread:$0]  (%p1726_p4), %s678_s6, 128, %s675_s16, %s662_s12  }
 0x1c2 PF: > { %s1727_s10 = sld [smem:[#allocation18_spill]]  ;;  %p928_p8 = scmp.ge.s32.totalorder %s1300_s15, 2 }
 0x1c3   : > { %s1728_s22 = sld [smem:[#allocation24_spill]] }
 0x1c8   : > { %s689_s17 = sand.u32 1, %s1727_s10  }
 0x1c9   : > { %p1729_p3 = scmp.ne.s32.totalorder %s1728_s22, 0  ;;  %s690_s25 = scalar_lea.sflag [#allocation5], %s689_s17 }
 0x1cb   : > { %p918_p7 = pnand %p928_p8, %p1729_p3 }
 0x1cd   : > { %p919_p11 = pneg %p918_p7 }
 0x1cf   : > { %1254 = dma.done.wait (%p919_p11), %s690_s25, 128  }
 0x1d0   : > { %1256 = vsyncadd (%p919_p11), %s690_s25, 4294967168  ;;  %s28_s15 = sadd.s32 1, %s1300_s15   ;;  %s1730_s6 = sld [smem:[#allocation19_spill]] }
 0x1d1   : > { %p25_p12 = scmp.ge.s32.totalorder %s28_s15, 6   ;;  %s1731_s10 = sld [smem:[#allocation22_spill]] }
 0x1d2   : > { %s1732_s16 = sld [smem:[#allocation20_spill]]  ;;  %s1734_s27 = smov %s1264_s28 }
 0x1d3   : > { %s1733_s24 = sld [smem:[#allocation21_spill]]  ;;  %s1735_s28 = smov %s1268_s29 }
 0x1d4   : > { %s1736_s29 = smov %s1532_s5  ;;  %s1737_s30 = smov %s1276_s9 }
 0x1d5   : > { %s1739_s11 = smov %s1292_s13  ;;  %s1740_s12 = smov %s1296_s14 }
 0x1d6   : > { %s1738_s9 = smov %s1730_s6  ;;  %27 = sbr.rel (!%p25_p12) target bundleno = 18 (0x12), region = 130 }
 0x1d8   : > { %s1741_s13 = smov %s1732_s16 }
 0x1d9   : > { %s1742_s14 = smov %s1733_s24 }
 0x1db   :  { %695 = vsyncpa [#allocation4], 1 }
 0x1dc   :  { %697 = vsyncpa [#allocation4 + $0x1], 1 }
 0x1dd   :  { %698 = vsyncpa [#allocation7], 1 }
 0x1de   :  { %700 = vsyncpa [#allocation7 + $0x1], 1 }
 0x1df   :  { %701 = vsyncpa [#allocation10], 1 }
 0x1e0   :  { %702 = vsyncpa [#allocation5], 1 }
 0x1e1   :  { %704 = vsyncpa [#allocation5 + $0x1], 1 }

// kernel: tpu_custom_call.1
= control target key start
LH: loop header
LB: loop body
LE: loop exit
PB: predicated region body
PF: predicated region fallthrough
CT: control target
= control target key end

     0   :  { %s1664_s0 = inlined_call_operand.hbm [shape: f32[2,16,32], index: 0, kind: input, shape index: {}]   ;;  %s1665_s1 = inlined_call_operand.hbm [shape: f32[2,16,32], index: 1, kind: input, shape index: {}]   ;;  %s1666_s2 = inlined_call_operand.hbm [shape: f32[8,32], index: 2, kind: input, shape index: {}]   ;;  %s1667_s3 = inlined_call_operand.vmem [shape: f32[1,32], index: 3, kind: input, shape index: {}]   ;;  %s1668_s4 = inlined_call_operand.hbm [shape: bf16[32,32], index: 4, kind: input, shape index: {}]   ;;  %s1669_s5 = inlined_call_operand.hbm [shape: bf16[32,32], index: 5, kind: input, shape index: {}]   ;;  %s1670_s6 = inlined_call_operand.vmem [shape: f32[1,32], index: 6, kind: input, shape index: {}]   ;;  %s1671_s7 = inlined_call_operand.vmem [shape: f32[1,32], index: 7, kind: input, shape index: {}]   ;;  %s1672_s8 = inlined_call_operand.hbm [shape: f32[2,16,32], index: 8, kind: output, shape index: {}]  }
   0x1   :  { %1687 = sst [smem:[#allocation25_spill]] %s1666_s2 }
   0x2   :  { %1688 = sst [smem:[#allocation26_spill]] %s1668_s4 }
   0x3   :  { %1689 = sst [smem:[#allocation27_spill]] %s1669_s5 }
   0x4   :  { %1690 = sst [smem:[#allocation28_spill]] %s1670_s6 }
   0x5   :  { %1691 = sst [smem:[#allocation29_spill]] %s1672_s8 }
   0x6   :  { %13 = vsyncpa [#allocation4], 0 }
   0x7   :  { %15 = vsyncpa [#allocation4 + $0x1], 0 }
   0x8   :  { %16 = vsyncpa [#allocation7], 0 }
   0x9   :  { %18 = vsyncpa [#allocation7 + $0x1], 0 }
   0xa   :  { %19 = vsyncpa [#allocation10], 0 }
   0xb   :  { %20 = vsyncpa [#allocation5], 0 }
   0xc   :  { %22 = vsyncpa [#allocation5 + $0x1], 0  ;;  %s1358_s27 = smov 0   ;;  %s1360_s28 = smov 0  }
   0xd   :  { %s1362_s29 = smov 0   ;;  %s1364_s30 = smov 0  }
   0xe   :  { %s1366_s9 = smov 0   ;;  %s1368_s10 = smov 0  }
   0xf   :  { %s1370_s11 = smov 0   ;;  %s1372_s12 = smov 0  }
  0x10   :  { %s1374_s13 = smov 0   ;;  %s1376_s14 = smov 0  }
  0x11   :  { %s1378_s15 = smov 0  }
  0x12 LB: > { %1692 = sst [smem:[#allocation18_spill]] %s1272_s30  ;;  %s1414_s16 = sadd.s32 4294967295, %s1300_s15   ;;  %s1300_s15 = sphi %s1378_s15, %s28_s15   ;;  %s1296_s14 = sphi %s1376_s14, %s1742_s14   ;;  %s1292_s13 = sphi %s1374_s13, %s1741_s13   ;;  %s1288_s12 = sphi %s1372_s12, %s1740_s12   ;;  %s1284_s11 = sphi %s1370_s11, %s1739_s11   ;;  %s1280_s10 = sphi %s1368_s10, %s1731_s10   ;;  %s1276_s9 = sphi %s1366_s9, %s1738_s9   ;;  %s1272_s30 = sphi %s1364_s30, %s1737_s30   ;;  %s1268_s29 = sphi %s1362_s29, %s1736_s29   ;;  %s1264_s28 = sphi %s1360_s28, %s1735_s28   ;;  %s1260_s27 = sphi %s1358_s27, %s1734_s27  }
  0x13   : > { %1693 = sst [smem:[#allocation19_spill]] %s1280_s10  ;;  %p819_p0 = scmp.ge.s32.totalorder %s1300_s15, 1 }
  0x14   : > { %p1673_p1 = scmp.eq.s32.totalorder %s1414_s16, 0  ;;  %p261_p2 = scmp.lt.s32.totalorder %s1300_s15, 5 }
  0x15   : > { %s1302_s18 = smov [#allocation8]   ;;  %s1303_s20 = smov [#allocation9]  }
  0x16   : > { %p1419_p3 = pnand %p819_p0, %p261_p2  ;;  %s274_s19 = sshll.u32 %s1302_s18, 4  ;;  %s275_s19 = int_to_ptr.vmem [resolvable:$true] %s274_s19 }
  0x17   : > { %s287_s21 = sshll.u32 %s1303_s20, 4  ;;  %s1304_s23 = smov [#allocation11]   ;;  %s288_s21 = int_to_ptr.vmem [resolvable:$true] %s287_s21 }
  0x18   : > { %s1694_s17 = scalar_select %p1419_p3, 1, 0 }
  0x19   : > { %p900_p4 = pneg %p1419_p3  ;;  %s300_s24 = sshll.u32 %s1304_s23, 4  ;;  %s301_s24 = int_to_ptr.vmem [resolvable:$true] %s300_s24 }
  0x1a   : > { %s1044_s25 = scalar_lea.vmem %s275_s19, 128  ;;  %p1052_p10 = scmp.lt.s32.totalorder %s275_s19, %s275_s19 }
  0x1b   : > { %p1427_p5 = pnand %p900_p4, %p1673_p1  ;;  %p1045_p7 = scmp.ne.s32.totalorder %s275_s19, %s1044_s25 }
  0x1c   : > { %p1053_p11 = scmp.lt.s32.totalorder %s1044_s25, %s1044_s25 }
  0x1d   : > { %p1035_p6 = pneg %p1427_p5 }
  0x1e   : > { %p1054_p12 = por %p1053_p11, %p1052_p10 }
  0x1f   : > { %p1047_p8 = pnand %p1045_p7, %p1035_p6 }
  0x21   : > { %p1048_p9 = pneg %p1047_p8 }
  0x23   : > { %p1055_p13 = pnand %p1054_p12, %p1048_p9 }
  0x25   : > { %1058 = shalt.err (!%p1055_p13)
}
  0x26   : > { %s1696_s2 = sld [smem:[#allocation25_spill]]  ;;  %s1070_s20 = scalar_lea.vmem %s288_s21, 256 }
  0x27   : > { %p1071_p0 = scmp.ne.s32.totalorder %s288_s21, %s1070_s20  ;;  %p1078_p7 = scmp.lt.s32.totalorder %s288_s21, %s288_s21 }
  0x28   : > { %p1079_p8 = scmp.lt.s32.totalorder %s1070_s20, %s1070_s20 }
  0x29   : > { %p1073_p2 = pnand %p1071_p0, %p1035_p6 }
  0x2a   : > { %p1080_p1 = por %p1079_p8, %p1078_p7 }
  0x2b   : > { %p1074_p4 = pneg %p1073_p2 }
  0x2c   : > { %903 = dma.hbm_to_vmem [thread:$0]  (!%p1427_p5), %s1696_s2, 128, %s275_s19, [#allocation7]  }
  0x2d   : > { %p1081_p3 = pnand %p1080_p1, %p1074_p4 }
  0x2f   : > { %1084 = shalt.err (!%p1081_p3)
}
  0x30   : > { %s1305_s23 = smov 64   ;;  %s1306_s25 = smov 4  }
  0x31   : > { %s1697_s4 = sld [smem:[#allocation26_spill]]  ;;  %s1096_s19 = scalar_lea.vmem %s301_s24, 256 }
  0x32   : > { %p1097_p9 = scmp.ne.s32.totalorder %s301_s24, %s1096_s19  ;;  %p1104_p12 = scmp.lt.s32.totalorder %s301_s24, %s301_s24 }
  0x33   : > { %p1105_p13 = scmp.lt.s32.totalorder %s1096_s19, %s1096_s19 }
  0x34   : > { %p1099_p10 = pnand %p1097_p9, %p1035_p6 }
  0x35   : > { %p1106_p1 = por %p1105_p13, %p1104_p12 }
  0x36   : > { %p1100_p11 = pneg %p1099_p10 }
  0x37   : > { %906 = dma.hbm_to_vmem [thread:$0]  (!%p1427_p5), %s1697_s4, 256, %s288_s21, [#allocation10], %s1305_s23, %s1305_s23, %s1306_s25  }
  0x38   : > { %p1107_p3 = pnand %p1106_p1, %p1100_p11 }
  0x3a   : > { %1110 = shalt.err (!%p1107_p3)
}
  0x3b   : > { %s1698_s5 = sld [smem:[#allocation27_spill]]  ;;  %s816_s8 = sadd.s32 4294967294, %s1300_s15  }
  0x3c   : > { %s37_s21 = sadd.s32 1, %s1292_s13  ;;  %s40_s22 = sadd.s32 1, %s1296_s14 }
  0x3d   : > { %p38_p6 = scmp.ge.s32.totalorder %s37_s21, 2  ;;  %s49_s26 = sadd.s32 1, %s1280_s10 }
  0x3e   : > { %p56_p0 = scmp.ne.s32.totalorder %s1280_s10, %s1276_s9  ;;  %p1683_p2 = scmp.eq.s32.totalorder %s1300_s15, 0 }
  0x3f   : > { %s1744_s21 = smov (%p38_p6, %s37_s21), 0  ;;  %s1746_s22 = smov (!%p38_p6, %s40_s22), %s1296_s14 }
  0x40   : > { %1699 = sst [smem:[#allocation20_spill]] %s1744_s21  ;;  %s45_s19 = ssub.s32 %s1292_s13, %s1744_s21 }
  0x41   : > { %909 = dma.hbm_to_vmem [thread:$0]  (!%p1427_p5), %s1698_s5, 256, %s301_s24, [#allocation10], %s1305_s23, %s1305_s23, %s1306_s25  }
  0x42   : > { %p1474_p5 = por %p1683_p2, %p56_p0  ;;  %p42_p4 = scmp.ge.s32.totalorder %s1746_s22, 2 }
  0x43   : > { %p62_p7 = scmp.ne.s32.totalorder %s1276_s9, %s1272_s30  ;;  %p1702_p8 = scmp.eq.s32.totalorder %s1414_s16, 0 }
  0x44   : > { %s1748_s22 = smov (%p42_p4, %s1746_s22), 0  ;;  %p248_p10 = scmp.eq.s32.totalorder %s1414_s16, 3 }
  0x45   : > { %1701 = sst [smem:[#allocation21_spill]] %s1748_s22  ;;  %p1484_p9 = por %p1702_p8, %p62_p7 }
  0x46   : > { %s1490_s25 = ssub.s32 %s1296_s14, %s1748_s22  ;;  %p254_p12 = scmp.eq.s32.totalorder %s816_s8, 3 }
  0x47   : > { %s1703_s23 = scalar_select %p1484_p9, 1, 0 }
  0x48   : > { %s46_s18 = sor.u32 %s45_s19, %s1490_s25  ;;  %p1500_p13 = por %p248_p10, %p56_p0 }
  0x49   : > { %p47_p11 = scmp.eq.s32.totalorder %s46_s18, 0  ;;  %p1504_p1 = por %p254_p12, %p62_p7 }
  0x4a   : > { %s1705_s2 = scalar_select %p1500_p13, 1, 0 }
  0x4b   : > { %s1495_s20 = scalar_select %p47_p11, %s1280_s10, %s49_s26  }
  0x4c   : > { %1706 = sst [smem:[#allocation23_spill]] %s1705_s2  ;;  %p924_p3 = scmp.lt.s32.totalorder %s1300_s15, 4 }
  0x4d   : > { %1704 = sst [smem:[#allocation22_spill]] %s1495_s20  ;;  %s320_s5 = sand.u32 1, %s1280_s10  }
  0x4e   : > { %s1707_s4 = scalar_select %p1504_p1, 1, 0 }
  0x4f   : > { %s824_s19 = sshll.u32 %s320_s5, 3  ;;  %s825_s22 = sshll.u32 %s1296_s14, 1 }
  0x50   : > { %1708 = sst [smem:[#allocation24_spill]] %s1707_s4  ;;  %s329_s18 = sadd.s32 %s1292_s13, %s825_s22 }
  0x51   : > { %s826_s21 = sshll.u32 %s329_s18, 7  ;;  %s324_s30 = scalar_lea.vmem [#allocation3], %s824_s19 }
  0x52   : > { %s333_s8 = sshll.u32 %s324_s30, 4  ;;  %s331_s6 = scalar_lea.hbm %s1664_s0, %s826_s21  ;;  %s334_s8 = int_to_ptr.vmem [resolvable:$true] %s333_s8 }
  0x53   : > { %p1520_p0 = pnand %p924_p3, %p1474_p5  ;;  %s321_s10 = scalar_lea.sflag [#allocation4], %s320_s5 }
  0x54   : > { %s1124_s4 = scalar_lea.vmem %s334_s8, 128  ;;  %s1307_s30 = smov [#allocation3]  }
  0x55   : > { %p1113_p4 = pneg %p1520_p0  ;;  %p1125_p7 = scmp.ne.s32.totalorder %s334_s8, %s1124_s4 }
  0x56   : > { %s1129_s22 = sshll.u32 %s1307_s30, 4  ;;  %s1130_s22 = int_to_ptr.vmem [resolvable:$false] %s1129_s22 }
  0x57   : > { %p1127_p8 = pnand %p1125_p7, %p1113_p4  ;;  %s1131_s20 = scalar_lea.vmem %s1130_s22, 256 }
  0x58   : > { %p1132_p11 = scmp.lt.s32.totalorder %s334_s8, %s1130_s22  ;;  %p1133_p12 = scmp.lt.s32.totalorder %s1131_s20, %s1124_s4 }
  0x59   : > { %p1128_p10 = pneg %p1127_p8 }
  0x5a   : > { %p1134_p2 = por %p1133_p12, %p1132_p11 }
  0x5c   : > { %p1135_p6 = pnand %p1134_p2, %p1128_p10 }
  0x5e   : > { %1138 = shalt.err (!%p1135_p6)
}
  0x5f   : > { %913 = dma.hbm_to_vmem [thread:$0]  (!%p1520_p0), %s331_s6, 128, %s334_s8, %s321_s10  }
  0x60   : > { %s83_s4 = sadd.s32 1, %s1268_s29  ;;  %p1710_p5 = scmp.eq.s32.totalorder %s1490_s25, 0 }
  0x61   : > { %p90_p2 = scmp.ne.s32.totalorder %s1268_s29, %s1264_s28  ;;  %p96_p6 = scmp.ne.s32.totalorder %s1264_s28, %s1260_s27 }
  0x62   : > { %s1532_s5 = scalar_select %p1710_p5, %s1268_s29, %s83_s4  }
  0x63   : > { %s340_s2 = sand.u32 1, %s1300_s15   ;;  %s342_s21 = sand.u32 1, %s1268_s29  }
  0x64   : > { %p1711_p4 = scmp.eq.s32.totalorder %s1300_s15, 0  ;;  %p1712_p8 = scmp.eq.s32.totalorder %s1414_s16, 0 }
  0x65   : > { %s827_s19 = sshll.u32 %s342_s21, 3  ;;  %s1257_s18 = sshll.u32 %s1296_s14, 8 }
  0x66   : > { %p92_p7 = por %p90_p2, %p1711_p4  ;;  %p1544_p10 = por %p96_p6, %p1712_p8 }
  0x67   : > { %s354_s6 = scalar_lea.hbm %s1665_s1, %s1257_s18  ;;  %s344_s10 = scalar_lea.vmem [#allocation6], %s827_s19 }
  0x68   : > { %s1713_s24 = scalar_select %p1544_p10, 1, 0 }
  0x69   : > { %s356_s25 = sshll.u32 %s344_s10, 4  ;;  %p1554_p0 = pnand %p924_p3, %p92_p7  ;;  %s357_s25 = int_to_ptr.vmem [resolvable:$true] %s356_s25 }
  0x6a   : > { %s341_s8 = scalar_lea.sflag [#allocation7], %s340_s2  ;;  %s1139_s22 = scalar_lea.hbm %s354_s6, 128 }
  0x6b   : > { %p1140_p11 = scmp.ne.s32.totalorder %s354_s6, %s1139_s22  ;;  %p1141_p12 = pneg %p1554_p0 }
  0x6c   : > { %p1145_p6 = scmp.lt.s32.totalorder %s354_s6, %s1665_s1 }
  0x6d   : > { %p1142_p5 = pnand %p1141_p12, %p1140_p11 }
  0x6f   : > { %p1143_p2 = pneg %p1142_p5 }
  0x71   : > { %p1148_p4 = pnand %p1145_p6, %p1143_p2 }
  0x73   : > { %1151 = shalt.err (!%p1148_p4)
}
  0x74   : > { %s1152_s21 = scalar_lea.vmem %s357_s25, 128  ;;  %s1308_s19 = smov [#allocation6]  }
  0x75   : > { %p1153_p8 = scmp.ne.s32.totalorder %s357_s25, %s1152_s21  ;;  %s1157_s18 = sshll.u32 %s1308_s19, 4  ;;  %s1158_s18 = int_to_ptr.vmem [resolvable:$false] %s1157_s18 }
  0x76   : > { %s1159_s2 = scalar_lea.vmem %s1158_s18, 256  ;;  %p1160_p1 = scmp.lt.s32.totalorder %s357_s25, %s1158_s18 }
  0x77   : > { %p1155_p3 = pnand %p1153_p8, %p1141_p12  ;;  %p1161_p13 = scmp.lt.s32.totalorder %s1159_s2, %s1152_s21 }
  0x79   : > { %p1156_p7 = pneg %p1155_p3  ;;  %p1162_p10 = por %p1161_p13, %p1160_p1 }
  0x7b   : > { %p1163_p9 = pnand %p1162_p10, %p1156_p7 }
  0x7d   : > { %1166 = shalt.err (!%p1163_p9)
}
  0x7e   : > { %916 = dma.hbm_to_vmem [thread:$0]  (!%p1554_p0), %s354_s6, 128, %s357_s25, %s341_s8  }
  0x7f   : > { %p1715_p11 = scmp.ne.s32.totalorder %s1694_s17, 0 }
  0x80   : > { %s1568_s26 = sand.u32 (!%p1715_p11), 1, %s1276_s9   ;;  %p1716_p12 = scmp.ne.s32.totalorder (!%p1715_p11), %s1703_s23, 0 }
  0x81   : > { %365 = sbr.rel (%p1715_p11) target bundleno = 450 (0x1c2), region = 52  ;;  %s832_s30 = sshll.u32 (!%p1715_p11), %s1568_s26, 3 }
  0x82   : > { %s368_s10 = scalar_lea.sflag (!%p1715_p11), [#allocation4], %s1568_s26  ;;  %s371_s22 = scalar_lea.vmem (!%p1715_p11), [#allocation3], %s832_s30 }
  0x86   : > { %1238 = dma.done.wait (%p1716_p12), %s368_s10, 128  }
  0x87   : > { %1240 = vsyncadd (%p1716_p12), %s368_s10, 4294967168  ;;  %s376_s6 = sand.u32 1, %s1414_s16   ;;  %s378_s17 = sand.u32 1, %s1264_s28  }
  0x88   : > { %s833_s25 = sshll.u32 %s378_s17, 3  ;;  %s377_s27 = scalar_lea.sflag [#allocation7], %s376_s6 }
  0x89   : > { %s380_s8 = scalar_lea.vmem [#allocation6], %s833_s25  ;;  %p1717_p9 = scmp.ne.s32.totalorder %s1713_s24, 0 }
  0x8b   : > { %1242 = dma.done.wait (%p1717_p9), %s377_s27, 128  }
  0x8c   : > { %1244 = vsyncadd (%p1717_p9), %s377_s27, 4294967168  ;;  %p1718_p13 = scmp.eq.s32.totalorder %s1414_s16, 0 }
  0x8e   : > { %1246 = dma.done.wait (%p1718_p13), [#allocation7], 128   ;;  %p1719_p1 = pmov %p1718_p13 }
  0x90   : > { %1248 = vsyncadd (%p1719_p1), [#allocation7], 4294967168  ;;  %p1720_p10 = pmov %p1719_p1 }
  0x91   : > { %p1721_p0 = pmov %p1719_p1 }
  0x92   : > { %1250 = dma.done.wait (%p1720_p10), [#allocation10], 512  }
  0x93   : > { %1252 = vsyncadd (%p1721_p0), [#allocation10], 4294966784  ;;  %v434_v0 = vld [vmem:[%s371_s22] sm:$0xff]  ;;  %s1590_s23 = scalar_lea.vmem [#allocation12], %s832_s30  ;;  %p838_p5 = scmp.ne.s32.totalorder %s1284_s11, 0 }
  0x95   : > { %438 = sbr.rel (%p838_p5) target bundleno = 156 (0x9c), region = 76 }
  0x9a   : > { %vm439_vm0 = vcmask 261120   ;;  %v1309_v1 = vmov 0.0  }
  0x9b   : > { %440 = vst.msk [vmem:[#allocation2] sm:$0xff] %vm439_vm0, %v1309_v1 }
  0x9c PF: > { %p839_p2 = scmp.le.s32.totalorder %s1284_s11, 0 }
  0x9e   : > { %444 = sbr.rel (%p839_p2) target bundleno = 165 (0xa5), region = 80 }
  0xa3   : > { %v445_v2 = vld [vmem:[%s380_s8] sm:$0xff]  ;;  %vm446_vm1 = vcmask 261120  }
  0xa4   : > { %447 = vst.msk [vmem:[#allocation2] sm:$0xff] %vm446_vm1, %v445_v2 }
  0xa5 PF: > { %v1025_v3 = vld [vmem:[#allocation11 + $0x8] sm:$0xff]   ;;  %v454_v4 = vlaneseq  ;;  %v1310_v5 = vmov 0.0   ;;  %v1026_v6 = vld [vmem:[#allocation11] sm:$0xff]   ;;  %vm1311_vm2 = vmmov 0   ;;  %vm448_vm3 = vcmask 261120   ;;  %v1027_v12 = vld [vmem:[#allocation9 + $0x8] sm:$0xff]  }
  0xa6   : > { %874 = vmatprep.subr.bf16.mxu1 %v1310_v5  ;;  %866 = vmatprep.subr.bf16.mxu0 %v1310_v5  ;;  %v450_v7 = vld [vmem:[%s1667_s3] sm:$0x1]  ;;  %v451_v8 = vld [vmem:[#allocation8] sm:$0x1]  ;;  %449 = vst.msk [vmem:[#allocation2 + $0x8] sm:$0xff] %vm448_vm3, %v434_v0  ;;  %v1028_v14 = vld [vmem:[#allocation9] sm:$0xff]  }
  0xa7   : > { %875 = vmatpush3.bf16.msra.mxu1 %v1025_v3  ;;  %878 = vmatprep.mubr.msk.bf16.mxu1 %vm1311_vm2, %v1310_v5  ;;  %v455_v9 = vshrl.u32 %v454_v4, 7  ;;  %v452_v10 = vadd.f32 %v451_v8, %v450_v7  ;;  %v840_v15 = vld [vmem:[#allocation8 + $0x1] ss:$0 sm:$0xff]  ;;  %v841_v16 = vld [vmem:[#allocation8 + $0x2] ss:$0 sm:$0xff]  ;;  %s856_s21 = sshll.u32 %s1288_s12, 1 }
  0xa8   : > { %876 = vmatprep.subr.bf16.mxu1 %v1310_v5  ;;  %870 = vmatprep.mubr.msk.bf16.mxu0 %vm1311_vm2, %v1310_v5  ;;  %v842_v18 = vld [vmem:[#allocation8 + $0x3] ss:$0 sm:$0xff]  ;;  %v843_v25 = vld [vmem:[#allocation8 + $0x4] ss:$0 sm:$0xff]  ;;  %v844_v29 = vld [vmem:[#allocation8 + $0x5] ss:$0 sm:$0xff]  ;;  %s673_s10 = sadd.s32 %s1284_s11, %s856_s21 }
  0xa9   : > { %v456_v11 = vsub.s32 0, %v455_v9  ;;  %867 = vmatpush3.bf16.msra.mxu0 %v1027_v12  ;;  %v845_v33 = vld [vmem:[#allocation8 + $0x6] ss:$0 sm:$0xff]  ;;  %v846_v37 = vld [vmem:[#allocation8 + $0x7] ss:$0 sm:$0xff]  ;;  %s1722_s2 = sld [smem:[#allocation28_spill]] }
  0xaa   : > { %868 = vmatprep.subr.bf16.mxu0 %v1310_v5  ;;  %v851_v54 = vld [vmem:[%s1671_s7] ss:$0 sm:$0xff]  ;;  %s1723_s30 = sld [smem:[#allocation23_spill]]  ;;  %s857_s22 = sshll.u32 %s673_s10, 7 }
  0xab   : > { %877 = vmatpush3.bf16.msra.mxu1 %v1026_v6  ;;  %v457_v13 = vrot.slane %v452_v10, %v456_v11  ;;  %s677_s6 = sshll.u32 %s1590_s23, 4  ;;  %s1724_s27 = sld [smem:[#allocation29_spill]]  ;;  %s678_s6 = int_to_ptr.vmem [resolvable:$true] %s677_s6 }
  0xac   : > { %s662_s12 = scalar_lea.sflag [#allocation5], %s1568_s26  ;;  %s1167_s24 = scalar_lea.vmem %s678_s6, 128 }
  0xad   : > { %v459_v17 = vmul.f32 %v457_v13, %v434_v0  ;;  %v460_v19 = vld [vmem:[#allocation2 + $0x7] sm:$0xff]  ;;  %869 = vmatpush3.bf16.msra.mxu0 %v1028_v14  ;;  %p1168_p6 = scmp.ne.s32.totalorder %s678_s6, %s1167_s24  ;;  %s1312_s11 = smov [#allocation12]  }
  0xae   : > { %v468_v20 = vld [vmem:[#allocation2 + $0x6] sm:$0xff]  ;;  %v466_v22 = vmul.f32 %v840_v15, %v460_v19  ;;  %s1171_s20 = sshll.u32 %s1312_s11, 4  ;;  %s1172_s20 = int_to_ptr.vmem [resolvable:$false] %s1171_s20 }
  0xaf   : > { %v476_v21 = vld [vmem:[#allocation2 + $0x5] sm:$0xff]  ;;  %v474_v23 = vmul.f32 %v841_v16, %v468_v20  ;;  %v847_v1 = vld [vmem:[%s1722_s2] ss:$0 sm:$0xff]  ;;  %s1173_s4 = scalar_lea.vmem %s1172_s20, 256  ;;  %p1174_p7 = scmp.lt.s32.totalorder %s678_s6, %s1172_s20 }
  0xb0   : > { %v484_v24 = vld [vmem:[#allocation2 + $0x4] sm:$0xff]  ;;  %v467_v26 = vadd.f32 %v466_v22, %v459_v17  ;;  %v482_v27 = vmul.f32 %v842_v18, %v476_v21  ;;  %p1726_p4 = scmp.ne.s32.totalorder %s1723_s30, 0  ;;  %p1175_p11 = scmp.lt.s32.totalorder %s1173_s4, %s1167_s24 }
  0xb1   : > { %v492_v28 = vld [vmem:[#allocation2 + $0x3] sm:$0xff]  ;;  %v490_v31 = vmul.f32 %v843_v25, %v484_v24  ;;  %s1725_s8 = smov %s1724_s27  ;;  %s675_s16 = scalar_lea.hbm %s1724_s27, %s857_s22 }
  0xb2   : > { %v475_v30 = vadd.f32 %v474_v23, %v467_v26  ;;  %v500_v32 = vld [vmem:[#allocation2 + $0x2] sm:$0xff]  ;;  %v498_v35 = vmul.f32 %v844_v29, %v492_v28  ;;  %p1169_p8 = pnand %p1168_p6, %p1726_p4  ;;  %p1176_p12 = por %p1175_p11, %p1174_p7 }
  0xb3   : > { %v508_v36 = vld [vmem:[#allocation2 + $0x1] sm:$0xff]  ;;  %v506_v39 = vmul.f32 %v845_v33, %v500_v32 }
  0xb4   : > { %v483_v34 = vadd.f32 %v482_v27, %v475_v30  ;;  %v514_v41 = vmul.f32 %v846_v37, %v508_v36  ;;  %p1170_p3 = pneg %p1169_p8 }
  0xb6   : > { %v491_v38 = vadd.f32 %v490_v31, %v483_v34  ;;  %p1177_p9 = pnand %p1176_p12, %p1170_p3 }
  0xb8   : > { %v499_v40 = vadd.f32 %v498_v35, %v491_v38 }
  0xba   : > { %v507_v42 = vadd.f32 %v506_v39, %v499_v40 }
  0xbc   : > { %v515_v43 = vadd.f32 %v514_v41, %v507_v42 }
  0xbe   : > { %v517_v44 = vmul.f32 %v515_v43, %v515_v43  ;;  %v516_v49 = vmul.f32 0.5, %v515_v43 }
  0xc0   : > { %v518_v45 = vmul.f32 %v517_v44, %v515_v43 }
  0xc2   : > { %v519_v46 = vmul.f32 0.044715, %v518_v45 }
  0xc4   : > { %v520_v47 = vadd.f32 %v519_v46, %v515_v43 }
  0xc6   : > { %v521_v48 = vmul.f32 0.7978846, %v520_v47 }
  0xc8   : > { %1029 = vtanh.f32 %v521_v48 }
  0xd5   : > { %v1030_v50 = vpop.eup %1029 }
  0xd6   : > { %v523_v51 = vadd.f32 1.0, %v1030_v50 }
  0xd8   : > { %v524_v52 = vmul.f32 %v523_v51, %v516_v49 }
  0xda   : > { %v525_v53 = vpack.c.bf16 %v524_v52, %v524_v52 }
  0xdc   : > { %879 = vmatmul.mubr.msk.bf16.vlgmr.msra.gmra.mxu1 %vm448_vm3, %v525_v53  ;;  %871 = vmatmul.mubr.msk.bf16.vlgmr.msra.gmra.mxu0 %vm448_vm3, %v525_v53 }
 0x19c   : > { %v649_v55 = vpop.f32.mrf.mxu1  ;;  %v586_v56 = vpop.f32.mrf.mxu0 }
 0x19d   : > { %v650_v57 = vadd.f32 %v851_v54, %v649_v55  ;;  %v587_v3 = vadd.f32 %v847_v1, %v586_v56 }
 0x19e   : > { %v880_v58 = vpop.f32.mrf.mxu1  ;;  %v872_v59 = vpop.f32.mrf.mxu0 }
 0x19f   : > { %v655_v60 = vmul.f32 0.5, %v650_v57 }
 0x1a0   : > { %v652_v61 = vpop.f32.mrf.mxu1  ;;  %v589_v62 = vpop.f32.mrf.mxu0 }
 0x1a1   : > { %1031 = vtanh.f32 %v655_v60 }
 0x1a2   : > { %v881_v63 = vpop.f32.mrf.mxu1  ;;  %v873_v0 = vpop.f32.mrf.mxu0 }
 0x1ae   : > { %v1032_v2 = vpop.eup %1031 }
 0x1af   : > { %v657_v4 = vmul.f32 0.5, %v1032_v2 }
 0x1b1   : > { %v658_v5 = vadd.f32 0.5, %v657_v4 }
 0x1b3   : > { %v659_v6 = vmul.f32 %v658_v5, %v587_v3 }
 0x1b5   : > { %660 = vst.msk [vmem:[%s1590_s23] sm:$0xff] %vm448_vm3, %v659_v6 }
 0x1b6   : > { %1180 = shalt.err (!%p1177_p9)
}
 0x1b7   : > { %s1181_s21 = scalar_lea.hbm %s675_s16, 128  ;;  %s1185_s19 = scalar_lea.hbm %s1725_s8, 512 }
 0x1b8   : > { %p1182_p13 = scmp.ne.s32.totalorder %s675_s16, %s1181_s21  ;;  %p1186_p0 = scmp.lt.s32.totalorder %s675_s16, %s1725_s8 }
 0x1b9   : > { %p1187_p5 = scmp.lt.s32.totalorder %s1185_s19, %s1181_s21 }
 0x1ba   : > { %p1183_p1 = pnand %p1182_p13, %p1726_p4 }
 0x1bb   : > { %p1188_p2 = por %p1187_p5, %p1186_p0 }
 0x1bc   : > { %p1184_p10 = pneg %p1183_p1 }
 0x1be   : > { %p1189_p6 = pnand %p1188_p2, %p1184_p10 }
 0x1c0   : > { %1192 = shalt.err (!%p1189_p6)
}
 0x1c1   : > { %898 = dma.vmem_to_hbm [thread:$0]  (%p1726_p4), %s678_s6, 128, %s675_s16, %s662_s12  }
 0x1c2 PF: > { %s1727_s10 = sld [smem:[#allocation18_spill]]  ;;  %p928_p8 = scmp.ge.s32.totalorder %s1300_s15, 2 }
 0x1c3   : > { %s1728_s22 = sld [smem:[#allocation24_spill]] }
 0x1c8   : > { %s689_s17 = sand.u32 1, %s1727_s10  }
 0x1c9   : > { %p1729_p3 = scmp.ne.s32.totalorder %s1728_s22, 0  ;;  %s690_s25 = scalar_lea.sflag [#allocation5], %s689_s17 }
 0x1cb   : > { %p918_p7 = pnand %p928_p8, %p1729_p3 }
 0x1cd   : > { %p919_p11 = pneg %p918_p7 }
 0x1cf   : > { %1254 = dma.done.wait (%p919_p11), %s690_s25, 128  }
 0x1d0   : > { %1256 = vsyncadd (%p919_p11), %s690_s25, 4294967168  ;;  %s28_s15 = sadd.s32 1, %s1300_s15   ;;  %s1730_s6 = sld [smem:[#allocation19_spill]] }
 0x1d1   : > { %p25_p12 = scmp.ge.s32.totalorder %s28_s15, 6   ;;  %s1731_s10 = sld [smem:[#allocation22_spill]] }
 0x1d2   : > { %s1732_s16 = sld [smem:[#allocation20_spill]]  ;;  %s1734_s27 = smov %s1264_s28 }
 0x1d3   : > { %s1733_s24 = sld [smem:[#allocation21_spill]]  ;;  %s1735_s28 = smov %s1268_s29 }
 0x1d4   : > { %s1736_s29 = smov %s1532_s5  ;;  %s1737_s30 = smov %s1276_s9 }
 0x1d5   : > { %s1739_s11 = smov %s1292_s13  ;;  %s1740_s12 = smov %s1296_s14 }
 0x1d6   : > { %s1738_s9 = smov %s1730_s6  ;;  %27 = sbr.rel (!%p25_p12) target bundleno = 18 (0x12), region = 130 }
 0x1d8   : > { %s1741_s13 = smov %s1732_s16 }
 0x1d9   : > { %s1742_s14 = smov %s1733_s24 }
 0x1db   :  { %695 = vsyncpa [#allocation4], 1 }
 0x1dc   :  { %697 = vsyncpa [#allocation4 + $0x1], 1 }
 0x1dd   :  { %698 = vsyncpa [#allocation7], 1 }
 0x1de   :  { %700 = vsyncpa [#allocation7 + $0x1], 1 }
 0x1df   :  { %701 = vsyncpa [#allocation10], 1 }
 0x1e0   :  { %702 = vsyncpa [#allocation5], 1 }
 0x1e1   :  { %704 = vsyncpa [#allocation5 + $0x1], 1 }

</bundles_post_ra>
